<compile_context>
chip_gen: v6e
topology: v6e:2x2x1
jax: 0.10.0
libtpu: 0.0.40
codegen_flags: <defaults>
</compile_context>

<pallas_src>
import functools
import math

import jax
import jax.numpy as jnp
from jax.experimental import pallas as pl
from jax.experimental.pallas import tpu as pltpu


# ----------------------------------------------------------------------------
# Fused kernel: conv3x3 (as 9 shifted matmuls) + ReLU + bilinear resize
# ----------------------------------------------------------------------------
def _downsample_kernel(x_ref, w_ref, rh_ref, rw_ref, o_ref, *, H, W, Ho, Wo):
    # x_ref : (1, H+2, W+2, Cin)   zero-padded NHWC image
    # w_ref : (9, Cin, Ct)         conv weights, tap-major, channel-padded
    # rh_ref: (Ho, H)              row interpolation matrix
    # rw_ref: (Ho, Wo, W)          col interpolation matrix, pre-broadcast over Ho
    # o_ref : (1, Ho, Wo, Ct)      downsampled NHWC output tile (Ct=128 lanes)
    x = x_ref[0]                                   # (H+2, W+2, Cin)
    cin = x.shape[-1]
    ct = w_ref.shape[-1]

    # --- conv 3x3, stride 1, pad 1: accumulate 9 shifted matmuls in f32 ------
    acc = jnp.zeros((H * W, ct), jnp.float32)
    for t in range(9):                             # unrolled at trace time
        kh, kw = t // 3, t % 3
        patch = x[kh:kh + H, kw:kw + W, :].reshape(H * W, cin)
        acc = acc + jnp.dot(patch, w_ref[t], preferred_element_type=jnp.float32)

    # --- ReLU (on the f32 accumulator) ---------------------------------------
    y = jnp.maximum(acc, 0.0)                      # (H*W, Ct)

    # --- bilinear resize, align_corners=False: rows then cols, on the MXU ----
    t_rows = jnp.dot(rh_ref[...], y.reshape(H, W * ct),
                     preferred_element_type=jnp.float32)          # (Ho, W*Ct)
    t_rows = t_rows.reshape(Ho, W, ct)
    out = jnp.einsum('ovw,owc->ovc', rw_ref[...], t_rows,
                     preferred_element_type=jnp.float32)          # (Ho, Wo, Ct)

    o_ref[0] = out.astype(o_ref.dtype)


# ----------------------------------------------------------------------------
# Bilinear interpolation matrix (PyTorch align_corners=False semantics)
# ----------------------------------------------------------------------------
def _bilinear_matrix(out_size, in_size, scale_factor):
    dst = jnp.arange(out_size, dtype=jnp.float32)
    # PyTorch uses 1/scale_factor when a scale_factor is supplied
    # (recompute_scale_factor=None/False, the modern default).
    src = (dst + 0.5) * (1.0 / scale_factor) - 0.5
    src = jnp.maximum(src, 0.0)
    i0 = jnp.clip(jnp.floor(src).astype(jnp.int32), 0, in_size - 1)
    i1 = jnp.clip(i0 + 1, 0, in_size - 1)
    w1 = src - i0.astype(jnp.float32)
    w0 = 1.0 - w1
    oh0 = jax.nn.one_hot(i0, in_size, dtype=jnp.float32)
    oh1 = jax.nn.one_hot(i1, in_size, dtype=jnp.float32)
    return w0[:, None] * oh0 + w1[:, None] * oh1


# ----------------------------------------------------------------------------
# DownSample forward
# ----------------------------------------------------------------------------
@functools.partial(jax.jit, static_argnames=("scale_factor",))
def downsample_forward(x_nchw, conv_weight, scale_factor):
    N, Cin, H, W = x_nchw.shape
    Cout = conv_weight.shape[0]
    Ho = int(math.floor(H * scale_factor))
    Wo = int(math.floor(W * scale_factor))

    TC = 128                                     # lane-dense output-channel tile
    Cpad = ((Cout + TC - 1) // TC) * TC
    n_ct = Cpad // TC

    # Layout plumbing in the wrapper (cheap, single pass over the input):
    # NCHW -> NHWC, zero-pad spatially by 1 for the conv halo.
    x_nhwc = jnp.transpose(x_nchw, (0, 2, 3, 1))
    xp = jnp.pad(x_nhwc, ((0, 0), (1, 1), (1, 1), (0, 0)))          # (N,H+2,W+2,Cin)

    # Weights (Cout, Cin, 3, 3) -> (9, Cin, Cpad), zero-padded channels.
    w = jnp.transpose(conv_weight, (2, 3, 1, 0)).reshape(9, Cin, Cout)
    w = jnp.pad(w, ((0, 0), (0, 0), (0, Cpad - Cout)))

    # Interpolation matrices; the col matrix is pre-transposed/broadcast so the
    # kernel never transposes per grid step.
    rh = _bilinear_matrix(Ho, H, scale_factor)                      # (Ho, H)
    rw = _bilinear_matrix(Wo, W, scale_factor)                      # (Wo, W)
    rw_b = jnp.broadcast_to(rw[None], (Ho, Wo, W))                  # (Ho, Wo, W)

    # VMEM budget: double-buffered blocks + in-kernel f32 temporaries, with
    # headroom; clamped to stay within every generation's physical VMEM.
    blk_bytes = 4 * ((H + 2) * (W + 2) * Cin + 9 * Cin * TC + Ho * H
                     + Ho * Wo * W + Ho * Wo * TC)
    tmp_bytes = 4 * (H * W * TC) * 3
    vmem_limit = int(min(max(2 * blk_bytes + tmp_bytes, 32 * 1024 * 1024),
                         64 * 1024 * 1024))

    kernel = functools.partial(_downsample_kernel, H=H, W=W, Ho=Ho, Wo=Wo)

    out = pl.pallas_call(
        kernel,
        out_shape=jax.ShapeDtypeStruct((N, Ho, Wo, Cpad), x_nchw.dtype),
        grid=(N, n_ct),
        in_specs=[
            pl.BlockSpec((1, H + 2, W + 2, Cin), lambda n, j: (n, 0, 0, 0)),
            pl.BlockSpec((9, Cin, TC), lambda n, j: (0, 0, j)),
            pl.BlockSpec((Ho, H), lambda n, j: (0, 0)),
            pl.BlockSpec((Ho, Wo, W), lambda n, j: (0, 0, 0)),
        ],
        out_specs=pl.BlockSpec((1, Ho, Wo, TC), lambda n, j: (n, 0, 0, j)),
        compiler_params=pltpu.CompilerParams(
            dimension_semantics=("parallel", "parallel"),
            vmem_limit_bytes=vmem_limit,
        ),
    )(xp, w, rh, rw_b)

    # Drop channel padding and return NCHW (small, downsampled array only).
    out = out[..., :Cout]
    return jnp.transpose(out, (0, 3, 1, 2))                         # (N,Cout,Ho,Wo)


if __name__ == "__main__":
    # small, deterministic example
    N, C_in, C_out, H, W = 2, 4, 8, 16, 16
    scale_factor = 0.5  # module is named DownSample; Upsample(scale=0.5) halves H, W

    key = jax.random.PRNGKey(0)
    kx, kw = jax.random.split(key)
    x = jax.random.normal(kx, (N, C_in, H, W), dtype=jnp.float32)
    conv_w = jax.random.normal(kw, (C_out, C_in, 3, 3), dtype=jnp.float32) * 0.1

    out = downsample_forward(x, conv_w, scale_factor)
    jax.block_until_ready(out)
    assert out.shape == (N, C_out, int(H * scale_factor), int(W * scale_factor))
    print("KERNEL_OK")
</pallas_src>

<mosaic_0001>
module attributes {stable_mosaic.version = 11 : i64} {
  func.func @_downsample_kernel(%arg0: i32, %arg1: i32, %arg2: memref<1x18x18x4xf32, #tpu.memory_space<vmem>>, %arg3: memref<9x4x128xf32, #tpu.memory_space<vmem>>, %arg4: memref<8x16xf32, #tpu.memory_space<vmem>>, %arg5: memref<8x8x16xf32, #tpu.memory_space<vmem>>, %arg6: memref<1x8x8x128xf32, #tpu.memory_space<vmem>>) attributes {dimension_semantics = [#tpu.dimension_semantics<parallel>, #tpu.dimension_semantics<parallel>], iteration_bounds = array<i64: 2, 1>, scalar_prefetch = 0 : i64, scratch_operands = 0 : i64, tpu.core_type = #tpu.core_type<tc>, window_params = [{transform_indices = @transform_0, window_bounds = array<i64: 1, 18, 18, 4>}, {transform_indices = @transform_1, window_bounds = array<i64: 9, 4, 128>}, {pipeline_mode = #tpu.pipeline_mode<synchronous>, transform_indices = @transform_2, window_bounds = array<i64: 8, 16>}, {pipeline_mode = #tpu.pipeline_mode<synchronous>, transform_indices = @transform_3, window_bounds = array<i64: 8, 8, 16>}, {transform_indices = @transform_4, window_bounds = array<i64: 1, 8, 8, 128>}]} {
    %c0 = arith.constant 0 : index
    %c0_0 = arith.constant 0 : index
    %c0_1 = arith.constant 0 : index
    %c0_2 = arith.constant 0 : index
    %0 = vector.load %arg2[%c0, %c0_0, %c0_1, %c0_2] : memref<1x18x18x4xf32, #tpu.memory_space<vmem>>, vector<1x18x18x4xf32>
    %1 = vector.shape_cast %0 : vector<1x18x18x4xf32> to vector<18x18x4xf32>
    %cst = arith.constant 0.000000e+00 : f32
    %2 = vector.broadcast %cst : f32 to vector<256x128xf32>
    %3 = vector.extract_strided_slice %1 {offsets = [0, 0, 0], sizes = [16, 16, 4], strides = [1, 1, 1]} : vector<18x18x4xf32> to vector<16x16x4xf32>
    %4 = vector.shape_cast %3 : vector<16x16x4xf32> to vector<256x4xf32>
    %c0_3 = arith.constant 0 : index
    %c0_4 = arith.constant 0 : index
    %c0_5 = arith.constant 0 : index
    %5 = vector.load %arg3[%c0_3, %c0_4, %c0_5] : memref<9x4x128xf32, #tpu.memory_space<vmem>>, vector<1x4x128xf32>
    %6 = vector.shape_cast %5 : vector<1x4x128xf32> to vector<4x128xf32>
    %cst_6 = arith.constant dense<0.000000e+00> : vector<256x128xf32>
    %7 = tpu.matmul %4, %6, %cst_6 {dimension_numbers = #tpu.dot_dimension_numbers<[1], [0], [0], [1], [0, 0, 1, 1], [], []>} : vector<256x4xf32>, vector<4x128xf32>, vector<256x128xf32> -> vector<256x128xf32>
    %8 = arith.addf %2, %7 : vector<256x128xf32>
    %9 = vector.extract_strided_slice %1 {offsets = [0, 1, 0], sizes = [16, 16, 4], strides = [1, 1, 1]} : vector<18x18x4xf32> to vector<16x16x4xf32>
    %10 = vector.shape_cast %9 : vector<16x16x4xf32> to vector<256x4xf32>
    %c1 = arith.constant 1 : index
    %c0_7 = arith.constant 0 : index
    %c0_8 = arith.constant 0 : index
    %11 = vector.load %arg3[%c1, %c0_7, %c0_8] : memref<9x4x128xf32, #tpu.memory_space<vmem>>, vector<1x4x128xf32>
    %12 = vector.shape_cast %11 : vector<1x4x128xf32> to vector<4x128xf32>
    %cst_9 = arith.constant dense<0.000000e+00> : vector<256x128xf32>
    %13 = tpu.matmul %10, %12, %cst_9 {dimension_numbers = #tpu.dot_dimension_numbers<[1], [0], [0], [1], [0, 0, 1, 1], [], []>} : vector<256x4xf32>, vector<4x128xf32>, vector<256x128xf32> -> vector<256x128xf32>
    %14 = arith.addf %8, %13 : vector<256x128xf32>
    %15 = vector.extract_strided_slice %1 {offsets = [0, 2, 0], sizes = [16, 16, 4], strides = [1, 1, 1]} : vector<18x18x4xf32> to vector<16x16x4xf32>
    %16 = vector.shape_cast %15 : vector<16x16x4xf32> to vector<256x4xf32>
    %c2 = arith.constant 2 : index
    %c0_10 = arith.constant 0 : index
    %c0_11 = arith.constant 0 : index
    %17 = vector.load %arg3[%c2, %c0_10, %c0_11] : memref<9x4x128xf32, #tpu.memory_space<vmem>>, vector<1x4x128xf32>
    %18 = vector.shape_cast %17 : vector<1x4x128xf32> to vector<4x128xf32>
    %cst_12 = arith.constant dense<0.000000e+00> : vector<256x128xf32>
    %19 = tpu.matmul %16, %18, %cst_12 {dimension_numbers = #tpu.dot_dimension_numbers<[1], [0], [0], [1], [0, 0, 1, 1], [], []>} : vector<256x4xf32>, vector<4x128xf32>, vector<256x128xf32> -> vector<256x128xf32>
    %20 = arith.addf %14, %19 : vector<256x128xf32>
    %21 = vector.extract_strided_slice %1 {offsets = [1, 0, 0], sizes = [16, 16, 4], strides = [1, 1, 1]} : vector<18x18x4xf32> to vector<16x16x4xf32>
    %22 = vector.shape_cast %21 : vector<16x16x4xf32> to vector<256x4xf32>
    %c3 = arith.constant 3 : index
    %c0_13 = arith.constant 0 : index
    %c0_14 = arith.constant 0 : index
    %23 = vector.load %arg3[%c3, %c0_13, %c0_14] : memref<9x4x128xf32, #tpu.memory_space<vmem>>, vector<1x4x128xf32>
    %24 = vector.shape_cast %23 : vector<1x4x128xf32> to vector<4x128xf32>
    %cst_15 = arith.constant dense<0.000000e+00> : vector<256x128xf32>
    %25 = tpu.matmul %22, %24, %cst_15 {dimension_numbers = #tpu.dot_dimension_numbers<[1], [0], [0], [1], [0, 0, 1, 1], [], []>} : vector<256x4xf32>, vector<4x128xf32>, vector<256x128xf32> -> vector<256x128xf32>
    %26 = arith.addf %20, %25 : vector<256x128xf32>
    %27 = vector.extract_strided_slice %1 {offsets = [1, 1, 0], sizes = [16, 16, 4], strides = [1, 1, 1]} : vector<18x18x4xf32> to vector<16x16x4xf32>
    %28 = vector.shape_cast %27 : vector<16x16x4xf32> to vector<256x4xf32>
    %c4 = arith.constant 4 : index
    %c0_16 = arith.constant 0 : index
    %c0_17 = arith.constant 0 : index
    %29 = vector.load %arg3[%c4, %c0_16, %c0_17] : memref<9x4x128xf32, #tpu.memory_space<vmem>>, vector<1x4x128xf32>
    %30 = vector.shape_cast %29 : vector<1x4x128xf32> to vector<4x128xf32>
    %cst_18 = arith.constant dense<0.000000e+00> : vector<256x128xf32>
    %31 = tpu.matmul %28, %30, %cst_18 {dimension_numbers = #tpu.dot_dimension_numbers<[1], [0], [0], [1], [0, 0, 1, 1], [], []>} : vector<256x4xf32>, vector<4x128xf32>, vector<256x128xf32> -> vector<256x128xf32>
    %32 = arith.addf %26, %31 : vector<256x128xf32>
    %33 = vector.extract_strided_slice %1 {offsets = [1, 2, 0], sizes = [16, 16, 4], strides = [1, 1, 1]} : vector<18x18x4xf32> to vector<16x16x4xf32>
    %34 = vector.shape_cast %33 : vector<16x16x4xf32> to vector<256x4xf32>
    %c5 = arith.constant 5 : index
    %c0_19 = arith.constant 0 : index
    %c0_20 = arith.constant 0 : index
    %35 = vector.load %arg3[%c5, %c0_19, %c0_20] : memref<9x4x128xf32, #tpu.memory_space<vmem>>, vector<1x4x128xf32>
    %36 = vector.shape_cast %35 : vector<1x4x128xf32> to vector<4x128xf32>
    %cst_21 = arith.constant dense<0.000000e+00> : vector<256x128xf32>
    %37 = tpu.matmul %34, %36, %cst_21 {dimension_numbers = #tpu.dot_dimension_numbers<[1], [0], [0], [1], [0, 0, 1, 1], [], []>} : vector<256x4xf32>, vector<4x128xf32>, vector<256x128xf32> -> vector<256x128xf32>
    %38 = arith.addf %32, %37 : vector<256x128xf32>
    %39 = vector.extract_strided_slice %1 {offsets = [2, 0, 0], sizes = [16, 16, 4], strides = [1, 1, 1]} : vector<18x18x4xf32> to vector<16x16x4xf32>
    %40 = vector.shape_cast %39 : vector<16x16x4xf32> to vector<256x4xf32>
    %c6 = arith.constant 6 : index
    %c0_22 = arith.constant 0 : index
    %c0_23 = arith.constant 0 : index
    %41 = vector.load %arg3[%c6, %c0_22, %c0_23] : memref<9x4x128xf32, #tpu.memory_space<vmem>>, vector<1x4x128xf32>
    %42 = vector.shape_cast %41 : vector<1x4x128xf32> to vector<4x128xf32>
    %cst_24 = arith.constant dense<0.000000e+00> : vector<256x128xf32>
    %43 = tpu.matmul %40, %42, %cst_24 {dimension_numbers = #tpu.dot_dimension_numbers<[1], [0], [0], [1], [0, 0, 1, 1], [], []>} : vector<256x4xf32>, vector<4x128xf32>, vector<256x128xf32> -> vector<256x128xf32>
    %44 = arith.addf %38, %43 : vector<256x128xf32>
    %45 = vector.extract_strided_slice %1 {offsets = [2, 1, 0], sizes = [16, 16, 4], strides = [1, 1, 1]} : vector<18x18x4xf32> to vector<16x16x4xf32>
    %46 = vector.shape_cast %45 : vector<16x16x4xf32> to vector<256x4xf32>
    %c7 = arith.constant 7 : index
    %c0_25 = arith.constant 0 : index
    %c0_26 = arith.constant 0 : index
    %47 = vector.load %arg3[%c7, %c0_25, %c0_26] : memref<9x4x128xf32, #tpu.memory_space<vmem>>, vector<1x4x128xf32>
    %48 = vector.shape_cast %47 : vector<1x4x128xf32> to vector<4x128xf32>
    %cst_27 = arith.constant dense<0.000000e+00> : vector<256x128xf32>
    %49 = tpu.matmul %46, %48, %cst_27 {dimension_numbers = #tpu.dot_dimension_numbers<[1], [0], [0], [1], [0, 0, 1, 1], [], []>} : vector<256x4xf32>, vector<4x128xf32>, vector<256x128xf32> -> vector<256x128xf32>
    %50 = arith.addf %44, %49 : vector<256x128xf32>
    %51 = vector.extract_strided_slice %1 {offsets = [2, 2, 0], sizes = [16, 16, 4], strides = [1, 1, 1]} : vector<18x18x4xf32> to vector<16x16x4xf32>
    %52 = vector.shape_cast %51 : vector<16x16x4xf32> to vector<256x4xf32>
    %c8 = arith.constant 8 : index
    %c0_28 = arith.constant 0 : index
    %c0_29 = arith.constant 0 : index
    %53 = vector.load %arg3[%c8, %c0_28, %c0_29] : memref<9x4x128xf32, #tpu.memory_space<vmem>>, vector<1x4x128xf32>
    %54 = vector.shape_cast %53 : vector<1x4x128xf32> to vector<4x128xf32>
    %cst_30 = arith.constant dense<0.000000e+00> : vector<256x128xf32>
    %55 = tpu.matmul %52, %54, %cst_30 {dimension_numbers = #tpu.dot_dimension_numbers<[1], [0], [0], [1], [0, 0, 1, 1], [], []>} : vector<256x4xf32>, vector<4x128xf32>, vector<256x128xf32> -> vector<256x128xf32>
    %56 = arith.addf %50, %55 : vector<256x128xf32>
    %cst_31 = arith.constant 0.000000e+00 : f32
    %57 = vector.broadcast %cst_31 : f32 to vector<256x128xf32>
    %58 = arith.maximumf %56, %57 : vector<256x128xf32>
    %c0_32 = arith.constant 0 : index
    %c0_33 = arith.constant 0 : index
    %59 = vector.load %arg4[%c0_32, %c0_33] : memref<8x16xf32, #tpu.memory_space<vmem>>, vector<8x16xf32>
    %60 = vector.shape_cast %58 : vector<256x128xf32> to vector<16x2048xf32>
    %cst_34 = arith.constant dense<0.000000e+00> : vector<8x2048xf32>
    %61 = tpu.matmul %59, %60, %cst_34 {dimension_numbers = #tpu.dot_dimension_numbers<[1], [0], [0], [1], [0, 0, 1, 1], [], []>} : vector<8x16xf32>, vector<16x2048xf32>, vector<8x2048xf32> -> vector<8x2048xf32>
    %62 = vector.shape_cast %61 : vector<8x2048xf32> to vector<8x16x128xf32>
    %c0_35 = arith.constant 0 : index
    %c0_36 = arith.constant 0 : index
    %c0_37 = arith.constant 0 : index
    %63 = vector.load %arg5[%c0_35, %c0_36, %c0_37] : memref<8x8x16xf32, #tpu.memory_space<vmem>>, vector<8x8x16xf32>
    "tpu.trace_start"() <{level = 10 : i32, message = "ovw,owc->ovc"}> : () -> ()
    %cst_38 = arith.constant dense<0.000000e+00> : vector<8x8x128xf32>
    %64 = tpu.matmul %63, %62, %cst_38 {dimension_numbers = #tpu.dot_dimension_numbers<[2], [1], [1], [2], [0, 0, 0, 1, 1, 2], [0], [0]>} : vector<8x8x16xf32>, vector<8x16x128xf32>, vector<8x8x128xf32> -> vector<8x8x128xf32>
    "tpu.trace_stop"() : () -> ()
    %c0_39 = arith.constant 0 : index
    %c0_40 = arith.constant 0 : index
    %c0_41 = arith.constant 0 : index
    %c0_42 = arith.constant 0 : index
    %65 = vector.load %arg6[%c0_39, %c0_40, %c0_41, %c0_42] : memref<1x8x8x128xf32, #tpu.memory_space<vmem>>, vector<1x8x8x128xf32>
    %66 = vector.shape_cast %65 : vector<1x8x8x128xf32> to vector<8x8x128xf32>
    %67 = vector.shape_cast %64 : vector<8x8x128xf32> to vector<1x8x8x128xf32>
    tpu.vector_store %arg6[%c0_39, %c0_40, %c0_41, %c0_42], %67 {strides = array<i32>} : memref<1x8x8x128xf32, #tpu.memory_space<vmem>>, vector<1x8x8x128xf32>,
    return
  }
  func.func @transform_0(%arg0: i32, %arg1: i32) -> (i32, i32, i32, i32) {
    %c0_i32 = arith.constant 0 : i32
    %c0_i32_0 = arith.constant 0 : i32
    %c0_i32_1 = arith.constant 0 : i32
    %c0_i32_2 = arith.constant 0 : i32
    return %arg0, %c0_i32, %c0_i32_0, %c0_i32_1 : i32, i32, i32, i32
  }
  func.func @transform_1(%arg0: i32, %arg1: i32) -> (i32, i32, i32) {
    %c0_i32 = arith.constant 0 : i32
    %c0_i32_0 = arith.constant 0 : i32
    %c0_i32_1 = arith.constant 0 : i32
    return %c0_i32, %c0_i32_0, %arg1 : i32, i32, i32
  }
  func.func @transform_2(%arg0: i32, %arg1: i32) -> (i32, i32) {
    %c0_i32 = arith.constant 0 : i32
    %c0_i32_0 = arith.constant 0 : i32
    %c0_i32_1 = arith.constant 0 : i32
    return %c0_i32, %c0_i32_0 : i32, i32
  }
  func.func @transform_3(%arg0: i32, %arg1: i32) -> (i32, i32, i32) {
    %c0_i32 = arith.constant 0 : i32
    %c0_i32_0 = arith.constant 0 : i32
    %c0_i32_1 = arith.constant 0 : i32
    %c0_i32_2 = arith.constant 0 : i32
    return %c0_i32, %c0_i32_0, %c0_i32_1 : i32, i32, i32
  }
  func.func @transform_4(%arg0: i32, %arg1: i32) -> (i32, i32, i32, i32) {
    %c0_i32 = arith.constant 0 : i32
    %c0_i32_0 = arith.constant 0 : i32
    %c0_i32_1 = arith.constant 0 : i32
    return %arg0, %c0_i32, %c0_i32_0, %arg1 : i32, i32, i32, i32
  }
}

</mosaic_0001>

<bundles_post_ra>
// kernel: downsample_forward.1
= control target key start
LH: loop header
LB: loop body
LE: loop exit
PB: predicated region body
PF: predicated region fallthrough
CT: control target
= control target key end

     0   :  { %s6458_s15 = smov 0   ;;  %s6460_s16 = smov 0   ;;  %s8525_s0 = inlined_call_operand.vmem [shape: f32[2,18,18,4], index: 0, kind: input, shape index: {}]   ;;  %s8526_s1 = inlined_call_operand.vmem [shape: f32[9,4,128], index: 1, kind: input, shape index: {}]   ;;  %s8527_s2 = inlined_call_operand.vmem [shape: f32[8,16], index: 2, kind: input, shape index: {}]   ;;  %s8528_s3 = inlined_call_operand.vmem [shape: f32[8,8,16], index: 3, kind: input, shape index: {}]   ;;  %s8529_s4 = inlined_call_operand.vmem [shape: f32[2,8,8,128], index: 4, kind: output, shape index: {}]  }
   0x1   :  { %s6462_s17 = smov 0  }
   0x2 LB: > { %s26_s18 = sadd.s32 1, %s6422_s16  ;;  %p5219_p0 = scmp.ge.s32.totalorder %s6426_s17, 1  ;;  %s6426_s17 = sphi %s6462_s17, %s14_s17   ;;  %s6422_s16 = sphi %s6460_s16, %s8750_s16   ;;  %s6418_s15 = sphi %s6458_s15, %s8749_s15  }
   0x3   : > { %p28_p1 = scmp.ge.s32.totalorder %s26_s18, 2  ;;  %p185_p2 = scmp.lt.s32.totalorder %s6426_s17, 3 }
   0x5   : > { %s8752_s18 = smov (%p28_p1, %s26_s18), 0  ;;  %p186_p3 = pnand %p5219_p0, %p185_p2 }
   0x7   : > { %189 = sbr.rel (%p186_p3) target bundleno = 1011 (0x3f3), region = 36 }
   0xc   : > { %v5223_v0 = vld [vmem:[%s8526_s1 + $0x4] sm:$0xf]  ;;  %vm486_vm0 = vcmask 1043456   ;;  %v289_v1 = vld [vmem:[%s8526_s1] sm:$0xf]  ;;  %p218_p4 = scmp.lt.s32.totalorder %s6418_s15, 1 }
   0xd   : > { %5868 = vmatprep.subr.msk.mxu0 %vm486_vm0, %v5223_v0  ;;  %5918 = vmatprep.subr.msk.mxu1 %vm486_vm0, %v289_v1  ;;  %v5290_v2 = vld [vmem:[%s8526_s1 + $0x8] sm:$0xf]  ;;  %v5324_v3 = vld [vmem:[%s8526_s1 + $0xc] sm:$0xf]  ;;  %vm421_vm1 = vcmask 31744   ;;  %vm338_vm2 = vcmask 1046528  }
   0xe   : > { %5869 = vmatpush3.msk.msra.mxu0 %vm486_vm0, %v5223_v0  ;;  %s8754_s15 = smov (!%p218_p4, %s6418_s15), 1  ;;  %5919 = vmatpush3.msk.msra.mxu1 %vm486_vm0, %v289_v1  ;;  %v6647_v52 = vld [vmem:[%s8526_s1 + $0x10] sm:$0xf]  ;;  %v6664_v57 = vld [vmem:[%s8526_s1 + $0x14] sm:$0xf]  ;;  %vm1007_vm3 = vcmask 1045504  }
   0xf   : > { %5968 = vmatprep.subr.msk.mxu0 %vm486_vm0, %v5290_v2  ;;  %6018 = vmatprep.subr.msk.mxu1 %vm486_vm0, %v5324_v3  ;;  %s6374_s27 = smul.u32 432, %s8754_s15  ;;  %vm3677_vm4 = vcmask 130048   ;;  %vm6430_vm5 = vmmov 0   ;;  %s5546_s11 = sshll.u32 %s8754_s15, 6 }
  0x10   : > { %s234_s14 = scalar_lea.vmem %s8529_s4, %s5546_s11 }
  0x11   : > { %s6500_s30 = scalar_lea.vmem %s8525_s0, %s6374_s27 }
  0x12   : > { %v6503_v4 = vld [vmem:[%s6500_s30] sm:$0xff]  ;;  %v6506_v5 = vld [vmem:[%s6500_s30 + $0x8] sm:$0xff]  ;;  %v6509_v6 = vld [vmem:[%s6500_s30 + $0x10] sm:$0x3] }
  0x13   : > { %v339_v7 = vrot.slane %v6503_v4, 1  ;;  %v340_v8 = vrot.slane %v6506_v5, 1  ;;  %5920 = vmatprep.mubr.msk.f32.mxu1 %vm421_vm1, %v6503_v4  ;;  %v342_v9 = vrot.slane %v6509_v6, 1  ;;  %v6517_v10 = vld [vmem:[%s6500_s30 + $0x18] sm:$0xff]  ;;  %v6520_v11 = vld [vmem:[%s6500_s30 + $0x20] sm:$0xff]  ;;  %v6530_v15 = vld [vmem:[%s6500_s30 + $0x30] sm:$0xff] }
  0x14   : > { %5921 = vmatmul.mubr.msk.f32.vlgmr.msra.gmra.mxu1 %vm421_vm1, %v6506_v5  ;;  %v344_v12 = vrot.slane %v6517_v10, 1  ;;  %v345_v13 = vrot.slane %v6520_v11, 1  ;;  %v6527_v14 = vld [vmem:[%s6500_s30 + $0x28] sm:$0x3]  ;;  %v6533_v16 = vld [vmem:[%s6500_s30 + $0x38] sm:$0xff]  ;;  %v349_v20 = vrot.slane %v6530_v15, 1 }
  0x15   : > { %v341_v17 = vsel %vm338_vm2, %v339_v7, %v340_v8  ;;  %v343_v18 = vsel %vm338_vm2, %v340_v8, %v342_v9  ;;  %5923 = vmatprep.mubr.msk.f32.mxu1 %vm421_vm1, %v6517_v10  ;;  %v347_v19 = vrot.slane %v6527_v14, 1  ;;  %v6542_v21 = vld [vmem:[%s6500_s30 + $0x40] sm:$0x3]  ;;  %6019 = vmatpush3.msk.msra.mxu1 %vm486_vm0, %v5324_v3  ;;  %v350_v23 = vrot.slane %v6533_v16, 1  ;;  %v6551_v24 = vld [vmem:[%s6500_s30 + $0x48] sm:$0xff]  ;;  %v6554_v25 = vld [vmem:[%s6500_s30 + $0x50] sm:$0xff] }
  0x16   : > { %5870 = vmatprep.mubr.msk.f32.mxu0 %vm421_vm1, %v341_v17  ;;  %v6547_v22 = vsel %vm338_vm2, %v344_v12, %v345_v13  ;;  %v352_v27 = vrot.slane %v6542_v21, 1  ;;  %v354_v29 = vrot.slane %v6551_v24, 1  ;;  %v355_v30 = vrot.slane %v6554_v25, 1  ;;  %v6573_v31 = vld [vmem:[%s6500_s30 + $0x58] sm:$0x3]  ;;  %v6577_v32 = vld [vmem:[%s6500_s30 + $0x60] sm:$0xff]  ;;  %6118 = vmatprep.subr.msk.mxu1 %vm486_vm0, %v6664_v57 }
  0x17   : > { %5871 = vmatmul.mubr.msk.f32.vlgmr.msra.gmra.mxu0 %vm421_vm1, %v343_v18  ;;  %v6560_v26 = vsel %vm338_vm2, %v345_v13, %v347_v19  ;;  %v6566_v28 = vsel %vm338_vm2, %v349_v20, %v350_v23  ;;  %v6580_v33 = vld [vmem:[%s6500_s30 + $0x68] sm:$0xff]  ;;  %v357_v35 = vrot.slane %v6573_v31, 1  ;;  %v359_v37 = vrot.slane %v6577_v32, 1  ;;  %v6600_v39 = vld [vmem:[%s6500_s30 + $0x70] sm:$0x3]  ;;  %v6603_v40 = vld [vmem:[%s6500_s30 + $0x78] sm:$0xff] }
  0x18   : > { %5873 = vmatprep.mubr.msk.f32.mxu0 %vm421_vm1, %v6547_v22  ;;  %5924 = vmatmul.mubr.msk.f32.gmra.mxu1 %vm421_vm1, %v6520_v11  ;;  %v6587_v34 = vsel %vm338_vm2, %v350_v23, %v352_v27  ;;  %v6593_v36 = vsel %vm338_vm2, %v354_v29, %v355_v30  ;;  %v360_v38 = vrot.slane %v6580_v33, 1  ;;  %v6606_v41 = vld [vmem:[%s6500_s30 + $0x80] sm:$0xff]  ;;  %v362_v43 = vrot.slane %v6600_v39, 1  ;;  %v6626_v47 = vld [vmem:[%s6500_s30 + $0x88] sm:$0x3]  ;;  %v6629_v48 = vld [vmem:[%s6500_s30 + $0x90] sm:$0xff] }
  0x19   : > { %5926 = vmatprep.mubr.msk.f32.mxu1 %vm421_vm1, %v6530_v15  ;;  %5969 = vmatpush3.msk.msra.mxu0 %vm486_vm0, %v5290_v2  ;;  %8611 = vst [vmem:[#allocation2_spill] sm:$0xff] %v6587_v34  ;;  %8612 = vst [vmem:[#allocation3_spill] sm:$0xff] %v6593_v36  ;;  %v6613_v42 = vsel %vm338_vm2, %v355_v30, %v357_v35  ;;  %v364_v45 = vrot.slane %v6603_v40, 1  ;;  %v365_v46 = vrot.slane %v6606_v41, 1  ;;  %v6632_v49 = vld [vmem:[%s6500_s30 + $0x98] sm:$0xff]  ;;  %v367_v51 = vrot.slane %v6626_v47, 1 }
  0x1a   : > { %8613 = vst [vmem:[#allocation4_spill] sm:$0xff] %v6613_v42  ;;  %v6619_v44 = vsel %vm338_vm2, %v359_v37, %v360_v38  ;;  %8615 = vst [vmem:[#allocation6_spill] sm:$0xff] %v6629_v48  ;;  %v6639_v50 = vsel %vm338_vm2, %v360_v38, %v362_v43  ;;  %v369_v54 = vrot.slane %v6629_v48, 1  ;;  %v370_v55 = vrot.slane %v6632_v49, 1  ;;  %v6657_v56 = vld [vmem:[%s6500_s30 + $0xa0] sm:$0x3]  ;;  %6068 = vmatprep.subr.msk.mxu0 %vm486_vm0, %v6647_v52 }
  0x1b   : > { %5874 = vmatmul.mubr.msk.f32.gmra.mxu0 %vm421_vm1, %v6560_v26  ;;  %8614 = vst [vmem:[#allocation5_spill] sm:$0xff] %v6619_v44  ;;  %8616 = vst [vmem:[#allocation7_spill] sm:$0xff] %v6639_v50  ;;  %v6650_v53 = vsel %vm338_vm2, %v364_v45, %v365_v46  ;;  %v6667_v58 = vld [vmem:[%s6500_s30 + $0xa8] sm:$0xff]  ;;  %v6670_v59 = vld [vmem:[%s6500_s30 + $0xb0] sm:$0xff]  ;;  %v1013_v60 = vrot.slane %v6517_v10, 2  ;;  %v6680_v61 = vsel %vm338_vm2, %v365_v46, %v367_v51  ;;  %v372_v62 = vrot.slane %v6657_v56, 1 }
  0x1c   : > { %5876 = vmatprep.mubr.msk.f32.mxu0 %vm421_vm1, %v6566_v28  ;;  %5927 = vmatmul.mubr.msk.f32.gmra.mxu1 %vm421_vm1, %v6533_v16  ;;  %8617 = vst [vmem:[#allocation8_spill] sm:$0xff] %v6650_v53  ;;  %8618 = vst [vmem:[#allocation9_spill] sm:$0xff] %v6667_v58  ;;  %v1014_v63 = vrot.slane %v6520_v11, 2  ;;  %v1016_v0 = vrot.slane %v6527_v14, 2  ;;  %v6688_v1 = vsel %vm338_vm2, %v369_v54, %v370_v55  ;;  %v374_v2 = vrot.slane %v6667_v58, 1  ;;  %v6698_v8 = vld [vmem:[%s6500_s30 + $0xc0] sm:$0xff] }
  0x1d   : > { %5929 = vmatprep.mubr.msk.f32.mxu1 %vm421_vm1, %v6551_v24  ;;  %8619 = vst [vmem:[#allocation10_spill] sm:$0xff] %v6680_v61  ;;  %8620 = vst [vmem:[#allocation11_spill] sm:$0xff] %v6688_v1  ;;  %v375_v3 = vrot.slane %v6670_v59, 1  ;;  %v6695_v7 = vld [vmem:[%s6500_s30 + $0xb8] sm:$0x3]  ;;  %v6701_v9 = vld [vmem:[%s6500_s30 + $0xc8] sm:$0xff]  ;;  %v6714_v14 = vsel %vm338_vm2, %v370_v55, %v372_v62 }
  0x1e   : > { %8621 = vst [vmem:[#allocation12_spill] sm:$0xff] %v6698_v8  ;;  %v6704_v12 = vsel %vm1007_vm3, %v1013_v60, %v1014_v63  ;;  %v6707_v13 = vsel %vm1007_vm3, %v1014_v63, %v1016_v0  ;;  %8622 = vst [vmem:[#allocation13_spill] sm:$0xff] %v6714_v14  ;;  %v377_v17 = vrot.slane %v6695_v7, 1  ;;  %v379_v19 = vrot.slane %v6698_v8, 1  ;;  %v6727_v23 = vld [vmem:[%s6500_s30 + $0xd0] sm:$0x3] }
  0x1f   : > { %5877 = vmatmul.mubr.msk.f32.gmra.mxu0 %vm421_vm1, %v6587_v34  ;;  %v6720_v18 = vsel %vm338_vm2, %v374_v2, %v375_v3  ;;  %v380_v20 = vrot.slane %v6701_v9, 1  ;;  %v6730_v27 = vld [vmem:[%s6500_s30 + $0xd8] sm:$0xff]  ;;  %v6733_v29 = vld [vmem:[%s6500_s30 + $0xe0] sm:$0xff]  ;;  %v382_v35 = vrot.slane %v6727_v23, 1  ;;  %v6753_v45 = vld [vmem:[%s6500_s30 + $0xe8] sm:$0x3] }
  0x20   : > { %5879 = vmatprep.mubr.msk.f32.mxu0 %vm421_vm1, %v6593_v36  ;;  %5930 = vmatmul.mubr.msk.f32.gmra.mxu1 %vm421_vm1, %v6554_v25  ;;  %8623 = vst [vmem:[#allocation14_spill] sm:$0xff] %v6720_v18  ;;  %8624 = vst [vmem:[#allocation15_spill] sm:$0xff] %v6730_v27  ;;  %v6740_v30 = vsel %vm338_vm2, %v375_v3, %v377_v17  ;;  %v384_v38 = vrot.slane %v6730_v27, 1  ;;  %v385_v43 = vrot.slane %v6733_v29, 1  ;;  %v6756_v46 = vld [vmem:[%s6500_s30 + $0xf0] sm:$0xff]  ;;  %v6759_v51 = vld [vmem:[%s6500_s30 + $0xf8] sm:$0xff] }
  0x21   : > { %5932 = vmatprep.mubr.msk.f32.mxu1 %vm421_vm1, %v6577_v32  ;;  %8625 = vst [vmem:[#allocation16_spill] sm:$0xff] %v6740_v30  ;;  %v6746_v37 = vsel %vm338_vm2, %v379_v19, %v380_v20  ;;  %8627 = vst [vmem:[#allocation18_spill] sm:$0xff] %v6756_v46  ;;  %v6766_v54 = vsel %vm338_vm2, %v380_v20, %v382_v35  ;;  %v387_v55 = vrot.slane %v6753_v45, 1  ;;  %v389_v62 = vrot.slane %v6756_v46, 1  ;;  %v6779_v0 = vld [vmem:[%s6500_s30 + $0x100] sm:$0x3] }
  0x22   : > { %8626 = vst [vmem:[#allocation17_spill] sm:$0xff] %v6746_v37  ;;  %8628 = vst [vmem:[#allocation19_spill] sm:$0xff] %v6766_v54  ;;  %v6772_v60 = vsel %vm338_vm2, %v384_v38, %v385_v43  ;;  %v390_v63 = vrot.slane %v6759_v51, 1  ;;  %v6782_v2 = vld [vmem:[%s6500_s30 + $0x108] sm:$0xff]  ;;  %v6785_v3 = vld [vmem:[%s6500_s30 + $0x110] sm:$0xff]  ;;  %v392_v19 = vrot.slane %v6779_v0, 1 }
  0x23   : > { %5880 = vmatmul.mubr.msk.f32.gmra.mxu0 %vm421_vm1, %v6613_v42  ;;  %8629 = vst [vmem:[#allocation20_spill] sm:$0xff] %v6772_v60  ;;  %8630 = vst [vmem:[#allocation21_spill] sm:$0xff] %v6782_v2  ;;  %v6792_v17 = vsel %vm338_vm2, %v385_v43, %v387_v55  ;;  %v394_v35 = vrot.slane %v6782_v2, 1  ;;  %v395_v38 = vrot.slane %v6785_v3, 1  ;;  %v6805_v43 = vld [vmem:[%s6500_s30 + $0x118] sm:$0x3] }
  0x24   : > { %5882 = vmatprep.mubr.msk.f32.mxu0 %vm421_vm1, %v6619_v44  ;;  %5933 = vmatmul.mubr.msk.f32.gmra.mxu1 %vm421_vm1, %v6580_v33  ;;  %8631 = vst [vmem:[#allocation22_spill] sm:$0xff] %v6792_v17  ;;  %v6798_v20 = vsel %vm338_vm2, %v389_v62, %v390_v63  ;;  %v6808_v55 = vld [vmem:[%s6500_s30 + $0x120] sm:$0xff]  ;;  %v6818_v62 = vsel %vm338_vm2, %v390_v63, %v392_v19  ;;  %v6831_v63 = vld [vmem:[%s6500_s30 + $0x130] sm:$0x3]  ;;  %v6834_v19 = vld [vmem:[%s6500_s30 + $0x138] sm:$0xff] }
  0x25   : > { %5935 = vmatprep.mubr.msk.f32.mxu1 %vm421_vm1, %v6603_v40  ;;  %8632 = vst [vmem:[#allocation23_spill] sm:$0xff] %v6798_v20  ;;  %8633 = vst [vmem:[#allocation24_spill] sm:$0xff] %v6808_v55  ;;  %v6909_v34 = vld [vmem:[%s6500_s30 + $0x178] sm:$0x3] }
  0x26   : > { %8634 = vst [vmem:[#allocation25_spill] sm:$0xff] %v6818_v62  ;;  %8636 = vst [vmem:[#allocation27_spill] sm:$0xff] %v6834_v19 }
  0x27   : > { %5883 = vmatmul.mubr.msk.f32.gmra.mxu0 %vm421_vm1, %v6639_v50 }
  0x28   : > { %5885 = vmatprep.mubr.msk.f32.mxu0 %vm421_vm1, %v6650_v53  ;;  %5936 = vmatmul.mubr.msk.f32.gmra.mxu1 %vm421_vm1, %v6606_v41 }
  0x29   : > { %5938 = vmatprep.mubr.msk.f32.mxu1 %vm421_vm1, %v6629_v48 }
  0x2b   : > { %5886 = vmatmul.mubr.msk.f32.gmra.mxu0 %vm421_vm1, %v6680_v61 }
  0x2c   : > { %5888 = vmatprep.mubr.msk.f32.mxu0 %vm421_vm1, %v6688_v1  ;;  %5939 = vmatmul.mubr.msk.f32.gmra.mxu1 %vm421_vm1, %v6632_v49  ;;  %v6863_v1 = vld [vmem:[%s6500_s30 + $0x158] sm:$0xff] }
  0x2d   : > { %5941 = vmatprep.mubr.msk.f32.mxu1 %vm421_vm1, %v6667_v58  ;;  %v410_v50 = vrot.slane %v6863_v1, 1 }
  0x2f   : > { %5889 = vmatmul.mubr.msk.f32.gmra.mxu0 %vm421_vm1, %v6714_v14 }
  0x30   : > { %5891 = vmatprep.mubr.msk.f32.mxu0 %vm421_vm1, %v6720_v18  ;;  %5942 = vmatmul.mubr.msk.f32.gmra.mxu1 %vm421_vm1, %v6670_v59  ;;  %v402_v18 = vrot.slane %v6831_v63, 1 }
  0x31   : > { %5944 = vmatprep.mubr.msk.f32.mxu1 %vm421_vm1, %v6698_v8 }
  0x33   : > { %5892 = vmatmul.mubr.msk.f32.gmra.mxu0 %vm421_vm1, %v6740_v30  ;;  %v6837_v30 = vld [vmem:[%s6500_s30 + $0x140] sm:$0xff] }
  0x34   : > { %5894 = vmatprep.mubr.msk.f32.mxu0 %vm421_vm1, %v6746_v37  ;;  %5945 = vmatmul.mubr.msk.f32.gmra.mxu1 %vm421_vm1, %v6701_v9  ;;  %v6824_v37 = vsel %vm338_vm2, %v394_v35, %v395_v38  ;;  %8637 = vst [vmem:[#allocation28_spill] sm:$0xff] %v6837_v30 }
  0x35   : > { %5947 = vmatprep.mubr.msk.f32.mxu1 %vm421_vm1, %v6730_v27  ;;  %8635 = vst [vmem:[#allocation26_spill] sm:$0xff] %v6824_v37 }
  0x37   : > { %5895 = vmatmul.mubr.msk.f32.gmra.mxu0 %vm421_vm1, %v6766_v54  ;;  %v397_v54 = vrot.slane %v6805_v43, 1 }
  0x38   : > { %5897 = vmatprep.mubr.msk.f32.mxu0 %vm421_vm1, %v6772_v60  ;;  %5948 = vmatmul.mubr.msk.f32.gmra.mxu1 %vm421_vm1, %v6733_v29  ;;  %v6811_v60 = vld [vmem:[%s6500_s30 + $0x128] sm:$0xff] }
  0x39   : > { %5950 = vmatprep.mubr.msk.f32.mxu1 %vm421_vm1, %v6756_v46  ;;  %v6844_v35 = vsel %vm338_vm2, %v395_v38, %v397_v54  ;;  %v6857_v54 = vld [vmem:[%s6500_s30 + $0x148] sm:$0x3]  ;;  %v6860_v38 = vld [vmem:[%s6500_s30 + $0x150] sm:$0xff] }
  0x3a   : > { %8638 = vst [vmem:[#allocation29_spill] sm:$0xff] %v6844_v35  ;;  %8640 = vst [vmem:[#allocation31_spill] sm:$0xff] %v6860_v38  ;;  %v407_v61 = vrot.slane %v6857_v54, 1 }
  0x3b   : > { %5898 = vmatmul.mubr.msk.f32.gmra.mxu0 %vm421_vm1, %v6792_v17  ;;  %v399_v17 = vrot.slane %v6808_v55, 1 }
  0x3c   : > { %5900 = vmatprep.mubr.msk.f32.mxu0 %vm421_vm1, %v6798_v20  ;;  %5951 = vmatmul.mubr.msk.f32.gmra.mxu1 %vm421_vm1, %v6759_v51  ;;  %v400_v20 = vrot.slane %v6811_v60, 1 }
  0x3d   : > { %5953 = vmatprep.mubr.msk.f32.mxu1 %vm421_vm1, %v6782_v2 }
  0x3e   : > { %v6850_v14 = vsel %vm338_vm2, %v399_v17, %v400_v20  ;;  %v6870_v17 = vsel %vm338_vm2, %v400_v20, %v402_v18  ;;  %v6886_v18 = vld [vmem:[%s6500_s30 + $0x168] sm:$0xff]  ;;  %v6889_v20 = vld [vmem:[%s6500_s30 + $0x170] sm:$0xff] }
  0x3f   : > { %5901 = vmatmul.mubr.msk.f32.gmra.mxu0 %vm421_vm1, %v6818_v62  ;;  %8639 = vst [vmem:[#allocation30_spill] sm:$0xff] %v6850_v14  ;;  %v404_v62 = vrot.slane %v6834_v19, 1  ;;  %8641 = vst [vmem:[#allocation32_spill] sm:$0xff] %v6870_v17  ;;  %v414_v36 = vrot.slane %v6886_v18, 1 }
  0x40   : > { %5903 = vmatprep.mubr.msk.f32.mxu0 %vm421_vm1, %v6824_v37  ;;  %5954 = vmatmul.mubr.msk.f32.gmra.mxu1 %vm421_vm1, %v6785_v3  ;;  %v405_v37 = vrot.slane %v6837_v30, 1 }
  0x41   : > { %5956 = vmatprep.mubr.msk.f32.mxu1 %vm421_vm1, %v6808_v55 }
  0x42   : > { %v6876_v53 = vsel %vm338_vm2, %v404_v62, %v405_v37  ;;  %v6896_v62 = vsel %vm338_vm2, %v405_v37, %v407_v61  ;;  %v417_v37 = vrot.slane %v6909_v34, 1 }
  0x43   : > { %5904 = vmatmul.mubr.msk.f32.gmra.mxu0 %vm421_vm1, %v6844_v35  ;;  %8642 = vst [vmem:[#allocation33_spill] sm:$0xff] %v6876_v53  ;;  %v409_v35 = vrot.slane %v6860_v38, 1  ;;  %8643 = vst [vmem:[#allocation34_spill] sm:$0xff] %v6896_v62 }
  0x44   : > { %5906 = vmatprep.mubr.msk.f32.mxu0 %vm421_vm1, %v6850_v14  ;;  %5957 = vmatmul.mubr.msk.f32.gmra.mxu1 %vm421_vm1, %v6811_v60  ;;  %v6883_v14 = vld [vmem:[%s6500_s30 + $0x160] sm:$0x3] }
  0x45   : > { %5959 = vmatprep.mubr.msk.f32.mxu1 %vm421_vm1, %v6834_v19  ;;  %v412_v44 = vrot.slane %v6883_v14, 1  ;;  %v6902_v42 = vsel %vm338_vm2, %v409_v35, %v410_v50 }
  0x47   : > { %5907 = vmatmul.mubr.msk.f32.gmra.mxu0 %vm421_vm1, %v6870_v17  ;;  %v415_v17 = vrot.slane %v6889_v20, 1  ;;  %v6916_v61 = vsel %vm338_vm2, %v410_v50, %v412_v44  ;;  %v1011_v44 = vrot.slane %v6509_v6, 2  ;;  %v1019_v6 = vrot.slane %v6533_v16, 2 }
  0x48   : > { %5909 = vmatprep.mubr.msk.f32.mxu0 %vm421_vm1, %v6876_v53  ;;  %5960 = vmatmul.mubr.msk.f32.gmra.mxu1 %vm421_vm1, %v6837_v30  ;;  %v1008_v53 = vrot.slane %v6503_v4, 2 }
  0x49   : > { %5962 = vmatprep.mubr.msk.f32.mxu1 %vm421_vm1, %v6860_v38  ;;  %v6922_v35 = vsel %vm338_vm2, %v414_v36, %v415_v17  ;;  %v6934_v50 = vsel %vm338_vm2, %v415_v17, %v417_v37  ;;  %v1023_v17 = vrot.slane %v6551_v24, 2  ;;  %v1026_v37 = vrot.slane %v6573_v31, 2 }
  0x4a   : > { %v1031_v31 = vrot.slane %v6600_v39, 2  ;;  %v1036_v39 = vrot.slane %v6626_v47, 2  ;;  %v1041_v47 = vrot.slane %v6657_v56, 2  ;;  %v1046_v56 = vrot.slane %v6695_v7, 2 }
  0x4b   : > { %5910 = vmatmul.mubr.msk.f32.gmra.mxu0 %vm421_vm1, %v6896_v62  ;;  %v1009_v62 = vrot.slane %v6506_v5, 2  ;;  %v1018_v5 = vrot.slane %v6530_v15, 2  ;;  %v1051_v7 = vrot.slane %v6727_v23, 2  ;;  %v1056_v23 = vrot.slane %v6753_v45, 2 }
  0x4c   : > { %5912 = vmatprep.mubr.msk.f32.mxu0 %vm421_vm1, %v6902_v42  ;;  %5963 = vmatmul.mubr.msk.f32.gmra.mxu1 %vm421_vm1, %v6863_v1  ;;  %v1061_v45 = vrot.slane %v6779_v0, 2  ;;  %v1066_v0 = vrot.slane %v6805_v43, 2  ;;  %v1071_v43 = vrot.slane %v6831_v63, 2  ;;  %v1076_v63 = vrot.slane %v6857_v54, 2 }
  0x4d   : > { %5965 = vmatprep.mubr.msk.f32.mxu1 %vm421_vm1, %v6886_v18  ;;  %v1010_v36 = vsel %vm1007_vm3, %v1008_v53, %v1009_v62  ;;  %v1012_v4 = vsel %vm1007_vm3, %v1009_v62, %v1011_v44  ;;  %v1021_v53 = vrot.slane %v6542_v21, 2  ;;  %v1024_v62 = vrot.slane %v6554_v25, 2 }
  0x4e   : > { %v1081_v54 = vrot.slane %v6883_v14, 2 }
  0x4f   : > { %5913 = vmatmul.mubr.msk.f32.gmra.mxu0 %vm421_vm1, %v6916_v61  ;;  %v6987_v21 = vsel %vm1007_vm3, %v1019_v6, %v1021_v53  ;;  %v6993_v44 = vsel %vm1007_vm3, %v1023_v17, %v1024_v62  ;;  %v1034_v53 = vrot.slane %v6606_v41, 2 }
  0x50   : > { %5915 = vmatprep.mubr.msk.f32.mxu0 %vm421_vm1, %v6922_v35  ;;  %5966 = vmatmul.mubr.msk.f32.gmra.mxu1 %vm421_vm1, %v6889_v20 }
  0x51   : > { %6020 = vmatprep.mubr.msk.f32.mxu1 %vm421_vm1, %v6517_v10  ;;  %v6956_v10 = vld [vmem:[%s8526_s1 + $0x1c] sm:$0xf] }
  0x53   : > { %5916 = vmatmul.mubr.msk.f32.gmra.mxu0 %vm421_vm1, %v6934_v50 }
  0x54   : > { %5970 = vmatprep.mubr.msk.f32.mxu0 %vm421_vm1, %v1010_v36  ;;  %6021 = vmatmul.mubr.msk.f32.vlgmr.msra.gmra.mxu1 %vm421_vm1, %v6520_v11  ;;  %v6962_v11 = vld [vmem:[%s8526_s1 + $0x18] sm:$0xf]  ;;  %v1029_v36 = vrot.slane %v6580_v33, 2 }
  0x55   : > { %6023 = vmatprep.mubr.msk.f32.mxu1 %vm421_vm1, %v6530_v15  ;;  %6119 = vmatpush3.msk.msra.mxu1 %vm486_vm0, %v6664_v57  ;;  %v6972_v57 = vsel %vm1007_vm3, %v1018_v5, %v1019_v6  ;;  %v1033_v6 = vrot.slane %v6603_v40, 2 }
  0x56   : > { %6218 = vmatprep.subr.msk.mxu1 %vm486_vm0, %v6956_v10  ;;  %v7021_v17 = vsel %vm1007_vm3, %v1029_v36, %v1031_v31 }
  0x57   : > { %5971 = vmatmul.mubr.msk.f32.vlgmr.msra.gmra.mxu0 %vm421_vm1, %v1012_v4  ;;  %v7004_v4 = vsel %vm1007_vm3, %v1024_v62, %v1026_v37  ;;  %8645 = vst [vmem:[#allocation36_spill] sm:$0xff] %v7021_v17  ;;  %v7027_v62 = vsel %vm1007_vm3, %v1033_v6, %v1034_v53  ;;  %v1038_v37 = vrot.slane %v6629_v48, 2  ;;  %v1043_v6 = vrot.slane %v6667_v58, 2 }
  0x58   : > { %5973 = vmatprep.mubr.msk.f32.mxu0 %vm421_vm1, %v6704_v12  ;;  %6024 = vmatmul.mubr.msk.f32.gmra.mxu1 %vm421_vm1, %v6533_v16  ;;  %8646 = vst [vmem:[#allocation37_spill] sm:$0xff] %v7027_v62 }
  0x59   : > { %6026 = vmatprep.mubr.msk.f32.mxu1 %vm421_vm1, %v6551_v24  ;;  %6069 = vmatpush3.msk.msra.mxu0 %vm486_vm0, %v6647_v52  ;;  %v1028_v52 = vrot.slane %v6577_v32, 2 }
  0x5a   : > { %6168 = vmatprep.subr.msk.mxu0 %vm486_vm0, %v6962_v11 }
  0x5b   : > { %5974 = vmatmul.mubr.msk.f32.gmra.mxu0 %vm421_vm1, %v6707_v13  ;;  %v7010_v5 = vsel %vm1007_vm3, %v1028_v52, %v1029_v36  ;;  %v1039_v52 = vrot.slane %v6632_v49, 2  ;;  %v7038_v36 = vsel %vm1007_vm3, %v1034_v53, %v1036_v39 }
  0x5c   : > { %5976 = vmatprep.mubr.msk.f32.mxu0 %vm421_vm1, %v6972_v57  ;;  %6027 = vmatmul.mubr.msk.f32.gmra.mxu1 %vm421_vm1, %v6554_v25  ;;  %8644 = vst [vmem:[#allocation35_spill] sm:$0xff] %v7010_v5  ;;  %8647 = vst [vmem:[#allocation38_spill] sm:$0xff] %v7038_v36 }
  0x5d   : > { %6029 = vmatprep.mubr.msk.f32.mxu1 %vm421_vm1, %v6577_v32  ;;  %v7044_v31 = vsel %vm1007_vm3, %v1038_v37, %v1039_v52  ;;  %v7055_v53 = vsel %vm1007_vm3, %v1039_v52, %v1041_v47  ;;  %v1048_v37 = vrot.slane %v6698_v8, 2 }
  0x5e   : > { %8648 = vst [vmem:[#allocation39_spill] sm:$0xff] %v7044_v31  ;;  %8649 = vst [vmem:[#allocation40_spill] sm:$0xff] %v7055_v53 }
  0x5f   : > { %5977 = vmatmul.mubr.msk.f32.gmra.mxu0 %vm421_vm1, %v6987_v21 }
  0x60   : > { %5979 = vmatprep.mubr.msk.f32.mxu0 %vm421_vm1, %v6993_v44  ;;  %6030 = vmatmul.mubr.msk.f32.gmra.mxu1 %vm421_vm1, %v6580_v33 }
  0x61   : > { %6032 = vmatprep.mubr.msk.f32.mxu1 %vm421_vm1, %v6603_v40 }
  0x63   : > { %5980 = vmatmul.mubr.msk.f32.gmra.mxu0 %vm421_vm1, %v7004_v4 }
  0x64   : > { %5982 = vmatprep.mubr.msk.f32.mxu0 %vm421_vm1, %v7010_v5  ;;  %6033 = vmatmul.mubr.msk.f32.gmra.mxu1 %vm421_vm1, %v6606_v41 }
  0x65   : > { %6035 = vmatprep.mubr.msk.f32.mxu1 %vm421_vm1, %v6629_v48  ;;  %v1044_v48 = vrot.slane %v6670_v59, 2 }
  0x67   : > { %5983 = vmatmul.mubr.msk.f32.gmra.mxu0 %vm421_vm1, %v7021_v17  ;;  %v7061_v39 = vsel %vm1007_vm3, %v1043_v6, %v1044_v48  ;;  %v7072_v52 = vsel %vm1007_vm3, %v1044_v48, %v1046_v56  ;;  %v1053_v6 = vrot.slane %v6730_v27, 2 }
  0x68   : > { %5985 = vmatprep.mubr.msk.f32.mxu0 %vm421_vm1, %v7027_v62  ;;  %6036 = vmatmul.mubr.msk.f32.gmra.mxu1 %vm421_vm1, %v6632_v49  ;;  %8650 = vst [vmem:[#allocation41_spill] sm:$0xff] %v7061_v39  ;;  %8651 = vst [vmem:[#allocation42_spill] sm:$0xff] %v7072_v52 }
  0x69   : > { %6038 = vmatprep.mubr.msk.f32.mxu1 %vm421_vm1, %v6667_v58  ;;  %v1049_v58 = vrot.slane %v6701_v9, 2 }
  0x6b   : > { %5986 = vmatmul.mubr.msk.f32.gmra.mxu0 %vm421_vm1, %v7038_v36  ;;  %v7078_v47 = vsel %vm1007_vm3, %v1048_v37, %v1049_v58  ;;  %v7089_v48 = vsel %vm1007_vm3, %v1049_v58, %v1051_v7  ;;  %v1058_v37 = vrot.slane %v6756_v46, 2 }
  0x6c   : > { %5988 = vmatprep.mubr.msk.f32.mxu0 %vm421_vm1, %v7044_v31  ;;  %6039 = vmatmul.mubr.msk.f32.gmra.mxu1 %vm421_vm1, %v6670_v59  ;;  %8652 = vst [vmem:[#allocation43_spill] sm:$0xff] %v7078_v47  ;;  %8653 = vst [vmem:[#allocation44_spill] sm:$0xff] %v7089_v48 }
  0x6d   : > { %6041 = vmatprep.mubr.msk.f32.mxu1 %vm421_vm1, %v6698_v8  ;;  %v1054_v8 = vrot.slane %v6733_v29, 2 }
  0x6f   : > { %5989 = vmatmul.mubr.msk.f32.gmra.mxu0 %vm421_vm1, %v7055_v53  ;;  %v7095_v56 = vsel %vm1007_vm3, %v1053_v6, %v1054_v8  ;;  %v7106_v58 = vsel %vm1007_vm3, %v1054_v8, %v1056_v23  ;;  %v1063_v6 = vrot.slane %v6782_v2, 2 }
  0x70   : > { %5991 = vmatprep.mubr.msk.f32.mxu0 %vm421_vm1, %v7061_v39  ;;  %6042 = vmatmul.mubr.msk.f32.gmra.mxu1 %vm421_vm1, %v6701_v9  ;;  %8654 = vst [vmem:[#allocation45_spill] sm:$0xff] %v7095_v56  ;;  %8655 = vst [vmem:[#allocation46_spill] sm:$0xff] %v7106_v58 }
  0x71   : > { %6044 = vmatprep.mubr.msk.f32.mxu1 %vm421_vm1, %v6730_v27  ;;  %v1059_v27 = vrot.slane %v6759_v51, 2 }
  0x73   : > { %5992 = vmatmul.mubr.msk.f32.gmra.mxu0 %vm421_vm1, %v7072_v52  ;;  %v7112_v7 = vsel %vm1007_vm3, %v1058_v37, %v1059_v27  ;;  %v7123_v8 = vsel %vm1007_vm3, %v1059_v27, %v1061_v45  ;;  %v1068_v37 = vrot.slane %v6808_v55, 2 }
  0x74   : > { %5994 = vmatprep.mubr.msk.f32.mxu0 %vm421_vm1, %v7078_v47  ;;  %6045 = vmatmul.mubr.msk.f32.gmra.mxu1 %vm421_vm1, %v6733_v29  ;;  %8656 = vst [vmem:[#allocation47_spill] sm:$0xff] %v7112_v7  ;;  %8657 = vst [vmem:[#allocation48_spill] sm:$0xff] %v7123_v8 }
  0x75   : > { %6047 = vmatprep.mubr.msk.f32.mxu1 %vm421_vm1, %v6756_v46  ;;  %v1064_v46 = vrot.slane %v6785_v3, 2 }
  0x77   : > { %5995 = vmatmul.mubr.msk.f32.gmra.mxu0 %vm421_vm1, %v7089_v48  ;;  %v7129_v23 = vsel %vm1007_vm3, %v1063_v6, %v1064_v46  ;;  %v7140_v27 = vsel %vm1007_vm3, %v1064_v46, %v1066_v0  ;;  %v1073_v6 = vrot.slane %v6834_v19, 2 }
  0x78   : > { %5997 = vmatprep.mubr.msk.f32.mxu0 %vm421_vm1, %v7095_v56  ;;  %6048 = vmatmul.mubr.msk.f32.gmra.mxu1 %vm421_vm1, %v6759_v51  ;;  %8658 = vst [vmem:[#allocation49_spill] sm:$0xff] %v7129_v23  ;;  %8659 = vst [vmem:[#allocation50_spill] sm:$0xff] %v7140_v27 }
  0x79   : > { %6050 = vmatprep.mubr.msk.f32.mxu1 %vm421_vm1, %v6782_v2  ;;  %v1069_v2 = vrot.slane %v6811_v60, 2 }
  0x7b   : > { %5998 = vmatmul.mubr.msk.f32.gmra.mxu0 %vm421_vm1, %v7106_v58  ;;  %v7146_v45 = vsel %vm1007_vm3, %v1068_v37, %v1069_v2  ;;  %v7157_v46 = vsel %vm1007_vm3, %v1069_v2, %v1071_v43  ;;  %v1078_v37 = vrot.slane %v6860_v38, 2 }
  0x7c   : > { %6000 = vmatprep.mubr.msk.f32.mxu0 %vm421_vm1, %v7112_v7  ;;  %6051 = vmatmul.mubr.msk.f32.gmra.mxu1 %vm421_vm1, %v6785_v3  ;;  %8660 = vst [vmem:[#allocation51_spill] sm:$0xff] %v7146_v45  ;;  %8661 = vst [vmem:[#allocation52_spill] sm:$0xff] %v7157_v46 }
  0x7d   : > { %6053 = vmatprep.mubr.msk.f32.mxu1 %vm421_vm1, %v6808_v55  ;;  %v1074_v55 = vrot.slane %v6837_v30, 2 }
  0x7f   : > { %6001 = vmatmul.mubr.msk.f32.gmra.mxu0 %vm421_vm1, %v7123_v8  ;;  %v7163_v0 = vsel %vm1007_vm3, %v1073_v6, %v1074_v55  ;;  %v7174_v2 = vsel %vm1007_vm3, %v1074_v55, %v1076_v63  ;;  %v1083_v6 = vrot.slane %v6886_v18, 2  ;;  %v1086_v55 = vrot.slane %v6909_v34, 2  ;;  %v7233_v34 = vld [vmem:[%s8526_s1 + $0x20] sm:$0xf] }
  0x80   : > { %6003 = vmatprep.mubr.msk.f32.mxu0 %vm421_vm1, %v7129_v23  ;;  %6054 = vmatmul.mubr.msk.f32.gmra.mxu1 %vm421_vm1, %v6811_v60  ;;  %8662 = vst [vmem:[#allocation53_spill] sm:$0xff] %v7163_v0  ;;  %8663 = vst [vmem:[#allocation54_spill] sm:$0xff] %v7174_v2 }
  0x81   : > { %6056 = vmatprep.mubr.msk.f32.mxu1 %vm421_vm1, %v6834_v19  ;;  %v1079_v19 = vrot.slane %v6863_v1, 2 }
  0x83   : > { %6004 = vmatmul.mubr.msk.f32.gmra.mxu0 %vm421_vm1, %v7140_v27  ;;  %v7180_v43 = vsel %vm1007_vm3, %v1078_v37, %v1079_v19  ;;  %v7194_v14 = vsel %vm1007_vm3, %v1079_v19, %v1081_v54  ;;  %v7205_v37 = vld [vmem:[%s6500_s30 + $0x188] sm:$0xff] }
  0x84   : > { %6006 = vmatprep.mubr.msk.f32.mxu0 %vm421_vm1, %v7146_v45  ;;  %6057 = vmatmul.mubr.msk.f32.gmra.mxu1 %vm421_vm1, %v6837_v30  ;;  %8664 = vst [vmem:[#allocation55_spill] sm:$0xff] %v7180_v43  ;;  %v7187_v30 = vld [vmem:[%s6500_s30 + $0x180] sm:$0xff]  ;;  %8665 = vst [vmem:[#allocation56_spill] sm:$0xff] %v7194_v14  ;;  %v8674_v54 = vld [vmem:[#allocation11_spill] sm:$0xff] }
  0x85   : > { %6059 = vmatprep.mubr.msk.f32.mxu1 %vm421_vm1, %v6860_v38  ;;  %v1084_v38 = vrot.slane %v6889_v20, 2 }
  0x87   : > { %6007 = vmatmul.mubr.msk.f32.gmra.mxu0 %vm421_vm1, %v7157_v46  ;;  %v7200_v63 = vsel %vm1007_vm3, %v1083_v6, %v1084_v38  ;;  %v7212_v19 = vsel %vm1007_vm3, %v1084_v38, %v1086_v55  ;;  %v8671_v38 = vld [vmem:[#allocation7_spill] sm:$0xff]  ;;  %v8675_v6 = vld [vmem:[#allocation13_spill] sm:$0xff]  ;;  %v8676_v55 = vld [vmem:[#allocation14_spill] sm:$0xff] }
  0x88   : > { %6009 = vmatprep.mubr.msk.f32.mxu0 %vm421_vm1, %v7163_v0  ;;  %6060 = vmatmul.mubr.msk.f32.gmra.mxu1 %vm421_vm1, %v6863_v1  ;;  %8666 = vst [vmem:[#allocation57_spill] sm:$0xff] %v7200_v63 }
  0x89   : > { %6062 = vmatprep.mubr.msk.f32.mxu1 %vm421_vm1, %v6886_v18 }
  0x8b   : > { %6010 = vmatmul.mubr.msk.f32.gmra.mxu0 %vm421_vm1, %v7174_v2 }
  0x8c   : > { %6012 = vmatprep.mubr.msk.f32.mxu0 %vm421_vm1, %v7180_v43  ;;  %6063 = vmatmul.mubr.msk.f32.gmra.mxu1 %vm421_vm1, %v6889_v20 }
  0x8d   : > { %6065 = vmatprep.mubr.msk.f32.mxu1 %vm421_vm1, %v7187_v30 }
  0x8f   : > { %6013 = vmatmul.mubr.msk.f32.gmra.mxu0 %vm421_vm1, %v7194_v14 }
  0x90   : > { %6015 = vmatprep.mubr.msk.f32.mxu0 %vm421_vm1, %v7200_v63  ;;  %6066 = vmatmul.mubr.msk.f32.gmra.mxu1 %vm421_vm1, %v7205_v37 }
  0x91   : > { %6120 = vmatprep.mubr.msk.f32.mxu1 %vm421_vm1, %v6704_v12  ;;  %v8669_v12 = vld [vmem:[#allocation4_spill] sm:$0xff] }
  0x93   : > { %6016 = vmatmul.mubr.msk.f32.gmra.mxu0 %vm421_vm1, %v7212_v19 }
  0x94   : > { %6070 = vmatprep.mubr.msk.f32.mxu0 %vm421_vm1, %v6547_v22  ;;  %6121 = vmatmul.mubr.msk.f32.vlgmr.msra.gmra.mxu1 %vm421_vm1, %v6707_v13  ;;  %v8667_v22 = vld [vmem:[#allocation2_spill] sm:$0xff]  ;;  %v8670_v13 = vld [vmem:[#allocation5_spill] sm:$0xff] }
  0x95   : > { %6123 = vmatprep.mubr.msk.f32.mxu1 %vm421_vm1, %v6972_v57  ;;  %6219 = vmatpush3.msk.msra.mxu1 %vm486_vm0, %v6956_v10  ;;  %v8672_v10 = vld [vmem:[#allocation8_spill] sm:$0xff] }
  0x97   : > { %6071 = vmatmul.mubr.msk.f32.vlgmr.msra.gmra.mxu0 %vm421_vm1, %v6560_v26  ;;  %v8668_v26 = vld [vmem:[#allocation3_spill] sm:$0xff] }
  0x98   : > { %6073 = vmatprep.mubr.msk.f32.mxu0 %vm421_vm1, %v6566_v28  ;;  %6124 = vmatmul.mubr.msk.f32.gmra.mxu1 %vm421_vm1, %v6987_v21 }
  0x99   : > { %6126 = vmatprep.mubr.msk.f32.mxu1 %vm421_vm1, %v6993_v44  ;;  %6169 = vmatpush3.msk.msra.mxu0 %vm486_vm0, %v6962_v11  ;;  %v8673_v11 = vld [vmem:[#allocation10_spill] sm:$0xff] }
  0x9a   : > { %6268 = vmatprep.subr.msk.mxu0 %vm486_vm0, %v7233_v34 }
  0x9b   : > { %6074 = vmatmul.mubr.msk.f32.gmra.mxu0 %vm421_vm1, %v8667_v22 }
  0x9c   : > { %6076 = vmatprep.mubr.msk.f32.mxu0 %vm421_vm1, %v8668_v26  ;;  %6127 = vmatmul.mubr.msk.f32.gmra.mxu1 %vm421_vm1, %v7004_v4 }
  0x9d   : > { %6129 = vmatprep.mubr.msk.f32.mxu1 %vm421_vm1, %v7010_v5 }
  0x9f   : > { %6077 = vmatmul.mubr.msk.f32.gmra.mxu0 %vm421_vm1, %v8669_v12 }
  0xa0   : > { %6079 = vmatprep.mubr.msk.f32.mxu0 %vm421_vm1, %v8670_v13  ;;  %6130 = vmatmul.mubr.msk.f32.gmra.mxu1 %vm421_vm1, %v7021_v17 }
  0xa1   : > { %6132 = vmatprep.mubr.msk.f32.mxu1 %vm421_vm1, %v7027_v62  ;;  %v1683_v62 = vrot.slane %v7187_v30, 1 }
  0xa3   : > { %6080 = vmatmul.mubr.msk.f32.gmra.mxu0 %vm421_vm1, %v8671_v38 }
  0xa4   : > { %6082 = vmatprep.mubr.msk.f32.mxu0 %vm421_vm1, %v8672_v10  ;;  %6133 = vmatmul.mubr.msk.f32.gmra.mxu1 %vm421_vm1, %v7038_v36  ;;  %v8678_v36 = vld [vmem:[#allocation17_spill] sm:$0xff] }
  0xa5   : > { %6135 = vmatprep.mubr.msk.f32.mxu1 %vm421_vm1, %v7044_v31  ;;  %v8677_v31 = vld [vmem:[#allocation16_spill] sm:$0xff] }
  0xa7   : > { %6083 = vmatmul.mubr.msk.f32.gmra.mxu0 %vm421_vm1, %v8673_v11 }
  0xa8   : > { %6085 = vmatprep.mubr.msk.f32.mxu0 %vm421_vm1, %v8674_v54  ;;  %6136 = vmatmul.mubr.msk.f32.gmra.mxu1 %vm421_vm1, %v7055_v53  ;;  %v8680_v53 = vld [vmem:[#allocation20_spill] sm:$0xff] }
  0xa9   : > { %6138 = vmatprep.mubr.msk.f32.mxu1 %vm421_vm1, %v7061_v39  ;;  %v8679_v39 = vld [vmem:[#allocation19_spill] sm:$0xff] }
  0xab   : > { %6086 = vmatmul.mubr.msk.f32.gmra.mxu0 %vm421_vm1, %v8675_v6 }
  0xac   : > { %6088 = vmatprep.mubr.msk.f32.mxu0 %vm421_vm1, %v8676_v55  ;;  %6139 = vmatmul.mubr.msk.f32.gmra.mxu1 %vm421_vm1, %v7072_v52  ;;  %v8682_v52 = vld [vmem:[#allocation23_spill] sm:$0xff] }
  0xad   : > { %6141 = vmatprep.mubr.msk.f32.mxu1 %vm421_vm1, %v7078_v47  ;;  %v8681_v47 = vld [vmem:[#allocation22_spill] sm:$0xff] }
  0xaf   : > { %6089 = vmatmul.mubr.msk.f32.gmra.mxu0 %vm421_vm1, %v8677_v31 }
  0xb0   : > { %6091 = vmatprep.mubr.msk.f32.mxu0 %vm421_vm1, %v8678_v36  ;;  %6142 = vmatmul.mubr.msk.f32.gmra.mxu1 %vm421_vm1, %v7089_v48  ;;  %v8684_v48 = vld [vmem:[#allocation26_spill] sm:$0xff] }
  0xb1   : > { %6144 = vmatprep.mubr.msk.f32.mxu1 %vm421_vm1, %v7095_v56  ;;  %v8683_v56 = vld [vmem:[#allocation25_spill] sm:$0xff] }
  0xb3   : > { %6092 = vmatmul.mubr.msk.f32.gmra.mxu0 %vm421_vm1, %v8679_v39 }
  0xb4   : > { %6094 = vmatprep.mubr.msk.f32.mxu0 %vm421_vm1, %v8680_v53  ;;  %6145 = vmatmul.mubr.msk.f32.gmra.mxu1 %vm421_vm1, %v7106_v58  ;;  %v8688_v58 = vld [vmem:[#allocation33_spill] sm:$0xff] }
  0xb5   : > { %6147 = vmatprep.mubr.msk.f32.mxu1 %vm421_vm1, %v7112_v7  ;;  %v8685_v7 = vld [vmem:[#allocation29_spill] sm:$0xff] }
  0xb7   : > { %6095 = vmatmul.mubr.msk.f32.gmra.mxu0 %vm421_vm1, %v8681_v47 }
  0xb8   : > { %6097 = vmatprep.mubr.msk.f32.mxu0 %vm421_vm1, %v8682_v52  ;;  %6148 = vmatmul.mubr.msk.f32.gmra.mxu1 %vm421_vm1, %v7123_v8  ;;  %v8686_v8 = vld [vmem:[#allocation30_spill] sm:$0xff] }
  0xb9   : > { %6150 = vmatprep.mubr.msk.f32.mxu1 %vm421_vm1, %v7129_v23  ;;  %v8687_v23 = vld [vmem:[#allocation32_spill] sm:$0xff] }
  0xbb   : > { %6098 = vmatmul.mubr.msk.f32.gmra.mxu0 %vm421_vm1, %v8683_v56 }
  0xbc   : > { %6100 = vmatprep.mubr.msk.f32.mxu0 %vm421_vm1, %v8684_v48  ;;  %6151 = vmatmul.mubr.msk.f32.gmra.mxu1 %vm421_vm1, %v7140_v27  ;;  %v1955_v27 = vrot.slane %v7205_v37, 2 }
  0xbd   : > { %6153 = vmatprep.mubr.msk.f32.mxu1 %vm421_vm1, %v7146_v45  ;;  %v1954_v45 = vrot.slane %v7187_v30, 2 }
  0xbf   : > { %6101 = vmatmul.mubr.msk.f32.gmra.mxu0 %vm421_vm1, %v8685_v7  ;;  %v7347_v17 = vsel %vm1007_vm3, %v1954_v45, %v1955_v27 }
  0xc0   : > { %6103 = vmatprep.mubr.msk.f32.mxu0 %vm421_vm1, %v8686_v8  ;;  %6154 = vmatmul.mubr.msk.f32.gmra.mxu1 %vm421_vm1, %v7157_v46  ;;  %v8689_v46 = vld [vmem:[#allocation34_spill] sm:$0xff] }
  0xc1   : > { %6156 = vmatprep.mubr.msk.f32.mxu1 %vm421_vm1, %v7163_v0  ;;  %v285_v0 = vld [vmem:[%s6500_s30 + $0x190] sm:$0x3] }
  0xc3   : > { %6104 = vmatmul.mubr.msk.f32.gmra.mxu0 %vm421_vm1, %v8687_v23 }
  0xc4   : > { %6106 = vmatprep.mubr.msk.f32.mxu0 %vm421_vm1, %v8688_v58  ;;  %6157 = vmatmul.mubr.msk.f32.gmra.mxu1 %vm421_vm1, %v7174_v2  ;;  %v1684_v2 = vrot.slane %v7205_v37, 1 }
  0xc5   : > { %6159 = vmatprep.mubr.msk.f32.mxu1 %vm421_vm1, %v7180_v43  ;;  %v1957_v43 = vrot.slane %v285_v0, 2 }
  0xc6   : > { %v7356_v5 = vsel %vm338_vm2, %v1683_v62, %v1684_v2 }
  0xc7   : > { %6107 = vmatmul.mubr.msk.f32.gmra.mxu0 %vm421_vm1, %v8689_v46 }
  0xc8   : > { %6109 = vmatprep.mubr.msk.f32.mxu0 %vm421_vm1, %v6902_v42  ;;  %6160 = vmatmul.mubr.msk.f32.gmra.mxu1 %vm421_vm1, %v7194_v14  ;;  %v1686_v14 = vrot.slane %v285_v0, 1 }
  0xc9   : > { %6162 = vmatprep.mubr.msk.f32.mxu1 %vm421_vm1, %v7200_v63  ;;  %v7361_v63 = vsel %vm1007_vm3, %v1955_v27, %v1957_v43 }
  0xca   : > { %v7368_v45 = vsel %vm338_vm2, %v1684_v2, %v1686_v14 }
  0xcb   : > { %6110 = vmatmul.mubr.msk.f32.gmra.mxu0 %vm421_vm1, %v6916_v61 }
  0xcc   : > { %6112 = vmatprep.mubr.msk.f32.mxu0 %vm421_vm1, %v6922_v35  ;;  %6163 = vmatmul.mubr.msk.f32.gmra.mxu1 %vm421_vm1, %v7212_v19 }
  0xcd   : > { %6165 = vmatprep.mubr.msk.f32.mxu1 %vm421_vm1, %v7347_v17 }
  0xcf   : > { %6113 = vmatmul.mubr.msk.f32.gmra.mxu0 %vm421_vm1, %v6934_v50 }
  0xd0   : > { %6115 = vmatprep.mubr.msk.f32.mxu0 %vm421_vm1, %v7356_v5  ;;  %6166 = vmatmul.mubr.msk.f32.gmra.mxu1 %vm421_vm1, %v7361_v63 }
  0xd1   : > { %6220 = vmatprep.mubr.msk.f32.mxu1 %vm421_vm1, %v6566_v28 }
  0xd3   : > { %6116 = vmatmul.mubr.msk.f32.gmra.mxu0 %vm421_vm1, %v7368_v45 }
  0xd4   : > { %6170 = vmatprep.mubr.msk.f32.mxu0 %vm421_vm1, %v6530_v15  ;;  %v5922_v62 = vpop.f32.mrf.mxu1  ;;  %6221 = vmatmul.mubr.msk.f32.vlgmr.msra.gmra.mxu1 %vm421_vm1, %v8667_v22 }
  0xd5   : > { %6223 = vmatprep.mubr.msk.f32.mxu1 %vm421_vm1, %v8668_v26 }
  0xd6   : > { %v848_v27 = vpop.f32.mrf.mxu1 }
  0xd7   : > { %v5872_v0 = vpop.f32.mrf.mxu0  ;;  %6171 = vmatmul.mubr.msk.f32.vlgmr.msra.gmra.mxu0 %vm421_vm1, %v6533_v16 }
  0xd8   : > { %v7384_v2 = vadd.f32 %v5922_v62, %v5872_v0  ;;  %6173 = vmatprep.mubr.msk.f32.mxu0 %vm421_vm1, %v6551_v24  ;;  %v5925_v28 = vpop.f32.mrf.mxu1  ;;  %6224 = vmatmul.mubr.msk.f32.gmra.mxu1 %vm421_vm1, %v8669_v12  ;;  %v8690_v0 = vld [vmem:[#allocation6_spill] sm:$0xff] }
  0xd9   : > { %v556_v15 = vpop.f32.mrf.mxu0  ;;  %6226 = vmatprep.mubr.msk.f32.mxu1 %vm421_vm1, %v8670_v13  ;;  %6269 = vmatpush3.msk.msra.mxu0 %vm486_vm0, %v7233_v34 }
  0xda   : > { %v7394_v43 = vadd.f32 %v848_v27, %v556_v15  ;;  %v858_v14 = vpop.f32.mrf.mxu1 }
  0xdb   : > { %v5875_v16 = vpop.f32.mrf.mxu0  ;;  %6174 = vmatmul.mubr.msk.f32.gmra.mxu0 %vm421_vm1, %v6554_v25 }
  0xdc   : > { %v7398_v22 = vadd.f32 %v5925_v28, %v5875_v16  ;;  %6176 = vmatprep.mubr.msk.f32.mxu0 %vm421_vm1, %v6577_v32  ;;  %v5928_v24 = vpop.f32.mrf.mxu1  ;;  %6227 = vmatmul.mubr.msk.f32.gmra.mxu1 %vm421_vm1, %v8671_v38 }
  0xdd   : > { %v566_v26 = vpop.f32.mrf.mxu0  ;;  %6229 = vmatprep.mubr.msk.f32.mxu1 %vm421_vm1, %v8672_v10 }
  0xde   : > { %v7406_v34 = vadd.f32 %v858_v14, %v566_v26  ;;  %v868_v12 = vpop.f32.mrf.mxu1  ;;  %v8691_v14 = vld [vmem:[#allocation9_spill] sm:$0xff] }
  0xdf   : > { %v5878_v13 = vpop.f32.mrf.mxu0  ;;  %6177 = vmatmul.mubr.msk.f32.gmra.mxu0 %vm421_vm1, %v6580_v33 }
  0xe0   : > { %v7410_v25 = vadd.f32 %v5928_v24, %v5878_v13  ;;  %6179 = vmatprep.mubr.msk.f32.mxu0 %vm421_vm1, %v6603_v40  ;;  %v5931_v32 = vpop.f32.mrf.mxu1  ;;  %6230 = vmatmul.mubr.msk.f32.gmra.mxu1 %vm421_vm1, %v8673_v11 }
  0xe1   : > { %v576_v38 = vpop.f32.mrf.mxu0  ;;  %6232 = vmatprep.mubr.msk.f32.mxu1 %vm421_vm1, %v8674_v54 }
  0xe2   : > { %v7418_v10 = vadd.f32 %v868_v12, %v576_v38  ;;  %v878_v62 = vpop.f32.mrf.mxu1  ;;  %v8692_v12 = vld [vmem:[#allocation12_spill] sm:$0xff] }
  0xe3   : > { %v5881_v27 = vpop.f32.mrf.mxu0  ;;  %6180 = vmatmul.mubr.msk.f32.gmra.mxu0 %vm421_vm1, %v6606_v41 }
  0xe4   : > { %v7422_v33 = vadd.f32 %v5931_v32, %v5881_v27  ;;  %6182 = vmatprep.mubr.msk.f32.mxu0 %vm421_vm1, %v8690_v0  ;;  %v5934_v40 = vpop.f32.mrf.mxu1  ;;  %6233 = vmatmul.mubr.msk.f32.gmra.mxu1 %vm421_vm1, %v8675_v6 }
  0xe5   : > { %v586_v11 = vpop.f32.mrf.mxu0  ;;  %6235 = vmatprep.mubr.msk.f32.mxu1 %vm421_vm1, %v8676_v55 }
  0xe6   : > { %v7430_v54 = vadd.f32 %v878_v62, %v586_v11  ;;  %v888_v28 = vpop.f32.mrf.mxu1  ;;  %v8693_v62 = vld [vmem:[#allocation15_spill] sm:$0xff]  ;;  %v8694_v11 = vld [vmem:[#allocation18_spill] sm:$0xff] }
  0xe7   : > { %v5884_v15 = vpop.f32.mrf.mxu0  ;;  %6183 = vmatmul.mubr.msk.f32.gmra.mxu0 %vm421_vm1, %v6632_v49 }
  0xe8   : > { %v7434_v41 = vadd.f32 %v5934_v40, %v5884_v15  ;;  %6185 = vmatprep.mubr.msk.f32.mxu0 %vm421_vm1, %v8691_v14  ;;  %v5937_v16 = vpop.f32.mrf.mxu1  ;;  %6236 = vmatmul.mubr.msk.f32.gmra.mxu1 %vm421_vm1, %v8677_v31 }
  0xe9   : > { %v596_v6 = vpop.f32.mrf.mxu0  ;;  %6238 = vmatprep.mubr.msk.f32.mxu1 %vm421_vm1, %v8678_v36 }
  0xea   : > { %v7442_v55 = vadd.f32 %v888_v28, %v596_v6  ;;  %v898_v24 = vpop.f32.mrf.mxu1 }
  0xeb   : > { %v5887_v26 = vpop.f32.mrf.mxu0  ;;  %6186 = vmatmul.mubr.msk.f32.gmra.mxu0 %vm421_vm1, %v6670_v59 }
  0xec   : > { %v7446_v49 = vadd.f32 %v5937_v16, %v5887_v26  ;;  %6188 = vmatprep.mubr.msk.f32.mxu0 %vm421_vm1, %v8692_v12  ;;  %v5940_v13 = vpop.f32.mrf.mxu1  ;;  %6239 = vmatmul.mubr.msk.f32.gmra.mxu1 %vm421_vm1, %v8679_v39  ;;  %v8695_v16 = vld [vmem:[#allocation21_spill] sm:$0xff]  ;;  %v8696_v26 = vld [vmem:[#allocation24_spill] sm:$0xff] }
  0xed   : > { %v606_v31 = vpop.f32.mrf.mxu0  ;;  %6241 = vmatprep.mubr.msk.f32.mxu1 %vm421_vm1, %v8680_v53 }
  0xee   : > { %v7454_v36 = vadd.f32 %v898_v24, %v606_v31  ;;  %v908_v32 = vpop.f32.mrf.mxu1  ;;  %v8697_v31 = vld [vmem:[#allocation27_spill] sm:$0xff] }
  0xef   : > { %v5890_v38 = vpop.f32.mrf.mxu0  ;;  %6189 = vmatmul.mubr.msk.f32.gmra.mxu0 %vm421_vm1, %v6701_v9 }
  0xf0   : > { %v7458_v59 = vadd.f32 %v5940_v13, %v5890_v38  ;;  %6191 = vmatprep.mubr.msk.f32.mxu0 %vm421_vm1, %v8693_v62  ;;  %v5943_v27 = vpop.f32.mrf.mxu1  ;;  %6242 = vmatmul.mubr.msk.f32.gmra.mxu1 %vm421_vm1, %v8681_v47  ;;  %v8698_v62 = vld [vmem:[#allocation28_spill] sm:$0xff] }
  0xf1   : > { %v616_v39 = vpop.f32.mrf.mxu0  ;;  %6244 = vmatprep.mubr.msk.f32.mxu1 %vm421_vm1, %v8682_v52 }
  0xf2   : > { %v7466_v53 = vadd.f32 %v908_v32, %v616_v39  ;;  %v918_v0 = vpop.f32.mrf.mxu1 }
  0xf3   : > { %v5893_v40 = vpop.f32.mrf.mxu0  ;;  %6192 = vmatmul.mubr.msk.f32.gmra.mxu0 %vm421_vm1, %v6733_v29 }
  0xf4   : > { %v7470_v9 = vadd.f32 %v5943_v27, %v5893_v40  ;;  %6194 = vmatprep.mubr.msk.f32.mxu0 %vm421_vm1, %v8694_v11  ;;  %v5946_v28 = vpop.f32.mrf.mxu1  ;;  %6245 = vmatmul.mubr.msk.f32.gmra.mxu1 %vm421_vm1, %v8683_v56  ;;  %v7530_v27 = vld [vmem:[%s6500_s30 + $0x1a0] sm:$0xff] }
  0xf5   : > { %v626_v47 = vpop.f32.mrf.mxu0  ;;  %6247 = vmatprep.mubr.msk.f32.mxu1 %vm421_vm1, %v8684_v48 }
  0xf6   : > { %v7478_v52 = vadd.f32 %v918_v0, %v626_v47  ;;  %v7480_v15 = vpop.f32.mrf.mxu1  ;;  %v8699_v0 = vld [vmem:[#allocation31_spill] sm:$0xff] }
  0xf7   : > { %v5896_v14 = vpop.f32.mrf.mxu0  ;;  %6195 = vmatmul.mubr.msk.f32.gmra.mxu0 %vm421_vm1, %v6759_v51  ;;  %v7547_v47 = vld [vmem:[%s6500_s30 + $0x1a8] sm:$0x3] }
  0xf8   : > { %v7484_v29 = vadd.f32 %v5946_v28, %v5896_v14  ;;  %6197 = vmatprep.mubr.msk.f32.mxu0 %vm421_vm1, %v8695_v16  ;;  %v5949_v6 = vpop.f32.mrf.mxu1  ;;  %6248 = vmatmul.mubr.msk.f32.gmra.mxu1 %vm421_vm1, %v8685_v7  ;;  %v2495_v28 = vrot.slane %v7530_v27, 1 }
  0xf9   : > { %v7490_v56 = vpop.f32.mrf.mxu0  ;;  %6250 = vmatprep.mubr.msk.f32.mxu1 %vm421_vm1, %v8686_v8 }
  0xfa   : > { %v7494_v48 = vpop.f32.mrf.mxu1 }
  0xfb   : > { %v5899_v24 = vpop.f32.mrf.mxu0  ;;  %6198 = vmatmul.mubr.msk.f32.gmra.mxu0 %vm421_vm1, %v6785_v3 }
  0xfc   : > { %v7498_v51 = vadd.f32 %v5949_v6, %v5899_v24  ;;  %6200 = vmatprep.mubr.msk.f32.mxu0 %vm421_vm1, %v8696_v26  ;;  %v5952_v12 = vpop.f32.mrf.mxu1  ;;  %6251 = vmatmul.mubr.msk.f32.gmra.mxu1 %vm421_vm1, %v8687_v23  ;;  %v2497_v6 = vrot.slane %v7547_v47, 1 }
  0xfd   : > { %v7504_v7 = vpop.f32.mrf.mxu0  ;;  %6253 = vmatprep.mubr.msk.f32.mxu1 %vm421_vm1, %v8688_v58 }
  0xfe   : > { %v7508_v8 = vpop.f32.mrf.mxu1 }
  0xff   : > { %v5902_v13 = vpop.f32.mrf.mxu0  ;;  %6201 = vmatmul.mubr.msk.f32.gmra.mxu0 %vm421_vm1, %v6811_v60  ;;  %v7527_v60 = vld [vmem:[%s6500_s30 + $0x198] sm:$0xff] }
 0x100   : > { %v7512_v3 = vadd.f32 %v5952_v12, %v5902_v13  ;;  %6203 = vmatprep.mubr.msk.f32.mxu0 %vm421_vm1, %v8697_v31  ;;  %v5955_v32 = vpop.f32.mrf.mxu1  ;;  %6254 = vmatmul.mubr.msk.f32.gmra.mxu1 %vm421_vm1, %v8689_v46  ;;  %v2494_v11 = vrot.slane %v7527_v60, 1  ;;  %v2498_v12 = vsel %vm338_vm2, %v2495_v28, %v2497_v6 }
 0x101   : > { %v7518_v23 = vpop.f32.mrf.mxu0  ;;  %6256 = vmatprep.mubr.msk.f32.mxu1 %vm421_vm1, %v6902_v42 }
 0x102   : > { %v7522_v58 = vpop.f32.mrf.mxu1 }
 0x103   : > { %v5905_v38 = vpop.f32.mrf.mxu0  ;;  %6204 = vmatmul.mubr.msk.f32.gmra.mxu0 %vm421_vm1, %v8698_v62 }
 0x104   : > { %v7532_v39 = vadd.f32 %v5955_v32, %v5905_v38  ;;  %6206 = vmatprep.mubr.msk.f32.mxu0 %vm421_vm1, %v8699_v0  ;;  %v5958_v46 = vpop.f32.mrf.mxu1  ;;  %6257 = vmatmul.mubr.msk.f32.gmra.mxu1 %vm421_vm1, %v6916_v61 }
 0x105   : > { %v7538_v42 = vpop.f32.mrf.mxu0  ;;  %6259 = vmatprep.mubr.msk.f32.mxu1 %vm421_vm1, %v6922_v35 }
 0x106   : > { %v7542_v40 = vpop.f32.mrf.mxu1 }
 0x107   : > { %v5908_v14 = vpop.f32.mrf.mxu0  ;;  %6207 = vmatmul.mubr.msk.f32.gmra.mxu0 %vm421_vm1, %v6863_v1  ;;  %v2496_v1 = vsel %vm338_vm2, %v2494_v11, %v2495_v28 }
 0x108   : > { %v7551_v16 = vadd.f32 %v5958_v46, %v5908_v14  ;;  %6209 = vmatprep.mubr.msk.f32.mxu0 %vm421_vm1, %v6886_v18  ;;  %v5961_v61 = vpop.f32.mrf.mxu1  ;;  %6260 = vmatmul.mubr.msk.f32.gmra.mxu1 %vm421_vm1, %v6934_v50 }
 0x109   : > { %v7557_v35 = vpop.f32.mrf.mxu0  ;;  %6262 = vmatprep.mubr.msk.f32.mxu1 %vm421_vm1, %v7356_v5 }
 0x10a   : > { %v7562_v24 = vpop.f32.mrf.mxu1 }
 0x10b   : > { %v5911_v26 = vpop.f32.mrf.mxu0  ;;  %6210 = vmatmul.mubr.msk.f32.gmra.mxu0 %vm421_vm1, %v6889_v20 }
 0x10c   : > { %v7567_v18 = vadd.f32 %v5961_v61, %v5911_v26  ;;  %6212 = vmatprep.mubr.msk.f32.mxu0 %vm421_vm1, %v7187_v30  ;;  %v5964_v50 = vpop.f32.mrf.mxu1  ;;  %6263 = vmatmul.mubr.msk.f32.gmra.mxu1 %vm421_vm1, %v7368_v45 }
 0x10d   : > { %v7573_v5 = vpop.f32.mrf.mxu0  ;;  %6265 = vmatprep.mubr.msk.f32.mxu1 %vm421_vm1, %v2496_v1 }
 0x10e   : > { %v7577_v13 = vpop.f32.mrf.mxu1 }
 0x10f   : > { %v5914_v31 = vpop.f32.mrf.mxu0  ;;  %6213 = vmatmul.mubr.msk.f32.gmra.mxu0 %vm421_vm1, %v7205_v37 }
 0x110   : > { %v7581_v20 = vadd.f32 %v5964_v50, %v5914_v31  ;;  %6215 = vmatprep.mubr.msk.f32.mxu0 %vm421_vm1, %v7527_v60  ;;  %v5967_v30 = vpop.f32.mrf.mxu1  ;;  %6266 = vmatmul.mubr.msk.f32.gmra.mxu1 %vm421_vm1, %v2498_v12  ;;  %v8700_v50 = vld [vmem:[#allocation35_spill] sm:$0xff] }
 0x111   : > { %v7586_v45 = vpop.f32.mrf.mxu0 }
 0x112   : > { %v7588_v32 = vpop.f32.mrf.mxu1 }
 0x113   : > { %v5917_v38 = vpop.f32.mrf.mxu0  ;;  %6216 = vmatmul.mubr.msk.f32.gmra.mxu0 %vm421_vm1, %v7530_v27 }
 0x114   : > { %v7592_v62 = vadd.f32 %v5967_v30, %v5917_v38  ;;  %6270 = vmatprep.mubr.msk.f32.mxu0 %vm421_vm1, %v6972_v57  ;;  %v6022_v37 = vpop.f32.mrf.mxu1  ;;  %v8701_v38 = vld [vmem:[#allocation36_spill] sm:$0xff] }
 0x115   : > { %v7596_v0 = vpop.f32.mrf.mxu0 }
 0x116   : > { %v7598_v46 = vpop.f32.mrf.mxu1 }
 0x117   : > { %v5972_v11 = vpop.f32.mrf.mxu0  ;;  %6271 = vmatmul.mubr.msk.f32.vlgmr.msra.gmra.mxu0 %vm421_vm1, %v6987_v21 }
 0x118   : > { %v1383_v28 = vadd.f32 %v5972_v11, %v7384_v2  ;;  %6273 = vmatprep.mubr.msk.f32.mxu0 %vm421_vm1, %v6993_v44  ;;  %v6025_v14 = vpop.f32.mrf.mxu1 }
 0x119   : > { %v1223_v61 = vpop.f32.mrf.mxu0 }
 0x11a   : > { %v7606_v6 = vadd.f32 %v1223_v61, %v7394_v43  ;;  %v7608_v57 = vadd.f32 %v6022_v37, %v1383_v28  ;;  %v7610_v1 = vpop.f32.mrf.mxu1  ;;  %v8702_v37 = vld [vmem:[#allocation37_spill] sm:$0xff] }
 0x11b   : > { %v5975_v26 = vpop.f32.mrf.mxu0  ;;  %6274 = vmatmul.mubr.msk.f32.gmra.mxu0 %vm421_vm1, %v7004_v4 }
 0x11c   : > { %v1385_v21 = vadd.f32 %v5975_v26, %v7398_v22  ;;  %6276 = vmatprep.mubr.msk.f32.mxu0 %vm421_vm1, %v8700_v50  ;;  %v6028_v2 = vpop.f32.mrf.mxu1  ;;  %v8703_v26 = vld [vmem:[#allocation38_spill] sm:$0xff]  ;;  %v8704_v50 = vld [vmem:[#allocation39_spill] sm:$0xff] }
 0x11d   : > { %v1233_v44 = vpop.f32.mrf.mxu0 }
 0x11e   : > { %v7618_v12 = vadd.f32 %v1233_v44, %v7406_v34  ;;  %v7620_v43 = vadd.f32 %v6025_v14, %v1385_v21  ;;  %v7622_v31 = vpop.f32.mrf.mxu1 }
 0x11f   : > { %v5978_v30 = vpop.f32.mrf.mxu0  ;;  %6277 = vmatmul.mubr.msk.f32.gmra.mxu0 %vm421_vm1, %v8701_v38 }
 0x120   : > { %v1387_v4 = vadd.f32 %v5978_v30, %v7410_v25  ;;  %6279 = vmatprep.mubr.msk.f32.mxu0 %vm421_vm1, %v8702_v37  ;;  %v6031_v22 = vpop.f32.mrf.mxu1 }
 0x121   : > { %v1243_v11 = vpop.f32.mrf.mxu0 }
 0x122   : > { %v7630_v28 = vadd.f32 %v1243_v11, %v7418_v10  ;;  %v7632_v34 = vadd.f32 %v6028_v2, %v1387_v4  ;;  %v7634_v14 = vpop.f32.mrf.mxu1  ;;  %v8705_v4 = vld [vmem:[#allocation40_spill] sm:$0xff]  ;;  %v8706_v11 = vld [vmem:[#allocation41_spill] sm:$0xff] }
 0x123   : > { %v5981_v61 = vpop.f32.mrf.mxu0  ;;  %6280 = vmatmul.mubr.msk.f32.gmra.mxu0 %vm421_vm1, %v8703_v26 }
 0x124   : > { %v1389_v21 = vadd.f32 %v5981_v61, %v7422_v33  ;;  %6282 = vmatprep.mubr.msk.f32.mxu0 %vm421_vm1, %v8704_v50  ;;  %v6034_v25 = vpop.f32.mrf.mxu1  ;;  %v8708_v50 = vld [vmem:[#allocation42_spill] sm:$0xff] }
 0x125   : > { %v1253_v44 = vpop.f32.mrf.mxu0 }
 0x126   : > { %v7642_v30 = vadd.f32 %v1253_v44, %v7430_v54  ;;  %v7644_v10 = vadd.f32 %v6031_v22, %v1389_v21  ;;  %v7646_v2 = vpop.f32.mrf.mxu1 }
 0x127   : > { %v5984_v38 = vpop.f32.mrf.mxu0  ;;  %6283 = vmatmul.mubr.msk.f32.gmra.mxu0 %vm421_vm1, %v8705_v4  ;;  %v8709_v4 = vld [vmem:[#allocation43_spill] sm:$0xff] }
 0x128   : > { %v1391_v37 = vadd.f32 %v5984_v38, %v7434_v41  ;;  %6285 = vmatprep.mubr.msk.f32.mxu0 %vm421_vm1, %v8706_v11  ;;  %v6037_v33 = vpop.f32.mrf.mxu1 }
 0x129   : > { %v1263_v61 = vpop.f32.mrf.mxu0 }
 0x12a   : > { %v7654_v26 = vadd.f32 %v1263_v61, %v7442_v55  ;;  %v7656_v54 = vadd.f32 %v6034_v25, %v1391_v37  ;;  %v7658_v22 = vpop.f32.mrf.mxu1  ;;  %v8711_v61 = vld [vmem:[#allocation44_spill] sm:$0xff] }
 0x12b   : > { %8707 = vst [vmem:[#allocation2_spill] sm:$0xff] %v7658_v22  ;;  %v5987_v21 = vpop.f32.mrf.mxu0  ;;  %6286 = vmatmul.mubr.msk.f32.gmra.mxu0 %vm421_vm1, %v8708_v50  ;;  %v8712_v22 = vld [vmem:[#allocation45_spill] sm:$0xff] }
 0x12c   : > { %v1393_v44 = vadd.f32 %v5987_v21, %v7446_v49  ;;  %6288 = vmatprep.mubr.msk.f32.mxu0 %vm421_vm1, %v8709_v4  ;;  %v6040_v41 = vpop.f32.mrf.mxu1 }
 0x12d   : > { %v1273_v38 = vpop.f32.mrf.mxu0 }
 0x12e   : > { %v7666_v11 = vadd.f32 %v1273_v38, %v7454_v36  ;;  %v7668_v55 = vadd.f32 %v6037_v33, %v1393_v44  ;;  %v7670_v25 = vpop.f32.mrf.mxu1  ;;  %v8715_v38 = vld [vmem:[#allocation46_spill] sm:$0xff] }
 0x12f   : > { %8710 = vst [vmem:[#allocation3_spill] sm:$0xff] %v7670_v25  ;;  %v5990_v37 = vpop.f32.mrf.mxu0  ;;  %6289 = vmatmul.mubr.msk.f32.gmra.mxu0 %vm421_vm1, %v8711_v61  ;;  %v8716_v25 = vld [vmem:[#allocation47_spill] sm:$0xff] }
 0x130   : > { %v1395_v50 = vadd.f32 %v5990_v37, %v7458_v59  ;;  %6291 = vmatprep.mubr.msk.f32.mxu0 %vm421_vm1, %v8712_v22  ;;  %v6043_v49 = vpop.f32.mrf.mxu1 }
 0x131   : > { %v1283_v21 = vpop.f32.mrf.mxu0 }
 0x132   : > { %v7678_v4 = vadd.f32 %v1283_v21, %v7466_v53  ;;  %v7680_v36 = vadd.f32 %v6040_v41, %v1395_v50  ;;  %v7682_v33 = vpop.f32.mrf.mxu1  ;;  %v8717_v21 = vld [vmem:[#allocation48_spill] sm:$0xff] }
 0x133   : > { %8714 = vst [vmem:[#allocation5_spill] sm:$0xff] %v7682_v33  ;;  %v5993_v44 = vpop.f32.mrf.mxu0  ;;  %6292 = vmatmul.mubr.msk.f32.gmra.mxu0 %vm421_vm1, %v8715_v38  ;;  %v929_v38 = vadd.f32 %v7480_v15, %v7490_v56 }
 0x134   : > { %8713 = vst [vmem:[#allocation4_spill] sm:$0xff] %v7680_v36  ;;  %v1397_v61 = vadd.f32 %v5993_v44, %v7470_v9  ;;  %6294 = vmatprep.mubr.msk.f32.mxu0 %vm421_vm1, %v8716_v25  ;;  %v6046_v59 = vpop.f32.mrf.mxu1  ;;  %v8718_v44 = vld [vmem:[#allocation49_spill] sm:$0xff] }
 0x135   : > { %v1293_v22 = vpop.f32.mrf.mxu0 }
 0x136   : > { %v7690_v37 = vadd.f32 %v1293_v22, %v7478_v52  ;;  %v7692_v53 = vadd.f32 %v6043_v49, %v1397_v61  ;;  %v1571_v41 = vpop.f32.mrf.mxu1  ;;  %v8720_v22 = vld [vmem:[#allocation50_spill] sm:$0xff] }
 0x137   : > { %v5996_v50 = vpop.f32.mrf.mxu0  ;;  %6295 = vmatmul.mubr.msk.f32.gmra.mxu0 %vm421_vm1, %v8717_v21  ;;  %v939_v21 = vadd.f32 %v7494_v48, %v7504_v7  ;;  %v949_v48 = vadd.f32 %v7508_v8, %v7518_v23  ;;  %v959_v8 = vadd.f32 %v7522_v58, %v7538_v42  ;;  %v969_v58 = vadd.f32 %v7542_v40, %v7557_v35 }
 0x138   : > { %v1399_v9 = vadd.f32 %v5996_v50, %v7484_v29  ;;  %6297 = vmatprep.mubr.msk.f32.mxu0 %vm421_vm1, %v8718_v44  ;;  %v6049_v25 = vpop.f32.mrf.mxu1  ;;  %v8721_v29 = vld [vmem:[#allocation51_spill] sm:$0xff]  ;;  %v979_v40 = vadd.f32 %v7562_v24, %v7573_v5  ;;  %v989_v24 = vadd.f32 %v7577_v13, %v7586_v45 }
 0x139   : > { %v1303_v33 = vpop.f32.mrf.mxu0 }
 0x13a   : > { %v1398_v36 = vadd.f32 %v1303_v33, %v929_v38  ;;  %v7701_v52 = vadd.f32 %v6046_v59, %v1399_v9  ;;  %v1581_v49 = vpop.f32.mrf.mxu1 }
 0x13b   : > { %v5999_v61 = vpop.f32.mrf.mxu0  ;;  %6298 = vmatmul.mubr.msk.f32.gmra.mxu0 %vm421_vm1, %v8720_v22 }
 0x13c   : > { %8719 = vst [vmem:[#allocation7_spill] sm:$0xff] %v7701_v52  ;;  %v1401_v15 = vadd.f32 %v5999_v61, %v7498_v51  ;;  %v7708_v56 = vadd.f32 %v1571_v41, %v1398_v36  ;;  %6300 = vmatprep.mubr.msk.f32.mxu0 %vm421_vm1, %v8721_v29  ;;  %v6052_v50 = vpop.f32.mrf.mxu1  ;;  %v8722_v52 = vld [vmem:[#allocation52_spill] sm:$0xff]  ;;  %v8723_v36 = vld [vmem:[#allocation53_spill] sm:$0xff]  ;;  %v8724_v29 = vld [vmem:[#allocation54_spill] sm:$0xff] }
 0x13d   : > { %v1313_v44 = vpop.f32.mrf.mxu0 }
 0x13e   : > { %v1400_v33 = vadd.f32 %v1313_v44, %v939_v21  ;;  %v7712_v59 = vadd.f32 %v6049_v25, %v1401_v15  ;;  %v1591_v38 = vpop.f32.mrf.mxu1 }
 0x13f   : > { %v6002_v9 = vpop.f32.mrf.mxu0  ;;  %6301 = vmatmul.mubr.msk.f32.gmra.mxu0 %vm421_vm1, %v8722_v52  ;;  %v8725_v52 = vld [vmem:[#allocation55_spill] sm:$0xff] }
 0x140   : > { %v1403_v51 = vadd.f32 %v6002_v9, %v7512_v3  ;;  %v7719_v7 = vadd.f32 %v1581_v49, %v1400_v33  ;;  %6303 = vmatprep.mubr.msk.f32.mxu0 %vm421_vm1, %v8723_v36  ;;  %v6055_v41 = vpop.f32.mrf.mxu1 }
 0x141   : > { %v1323_v61 = vpop.f32.mrf.mxu0 }
 0x142   : > { %v1402_v22 = vadd.f32 %v1323_v61, %v949_v48  ;;  %v7723_v25 = vadd.f32 %v6052_v50, %v1403_v51  ;;  %v1601_v21 = vpop.f32.mrf.mxu1  ;;  %v8726_v51 = vld [vmem:[#allocation56_spill] sm:$0xff]  ;;  %v2765_v61 = vrot.slane %v7527_v60, 2 }
 0x143   : > { %v6005_v15 = vpop.f32.mrf.mxu0  ;;  %6304 = vmatmul.mubr.msk.f32.gmra.mxu0 %vm421_vm1, %v8724_v29 }
 0x144   : > { %v1405_v3 = vadd.f32 %v6005_v15, %v7532_v39  ;;  %v7730_v23 = vadd.f32 %v1591_v38, %v1402_v22  ;;  %6306 = vmatprep.mubr.msk.f32.mxu0 %vm421_vm1, %v8725_v52  ;;  %v6058_v49 = vpop.f32.mrf.mxu1  ;;  %v8727_v38 = vld [vmem:[#allocation57_spill] sm:$0xff]  ;;  %v2766_v22 = vrot.slane %v7530_v27, 2  ;;  %v2768_v27 = vrot.slane %v7547_v47, 2 }
 0x145   : > { %v1333_v44 = vpop.f32.mrf.mxu0 }
 0x146   : > { %v1404_v33 = vadd.f32 %v1333_v44, %v959_v8  ;;  %v7734_v50 = vadd.f32 %v6055_v41, %v1405_v3  ;;  %v1611_v9 = vpop.f32.mrf.mxu1  ;;  %v2767_v52 = vsel %vm1007_vm3, %v2765_v61, %v2766_v22  ;;  %v2769_v47 = vsel %vm1007_vm3, %v2766_v22, %v2768_v27 }
 0x147   : > { %v6008_v48 = vpop.f32.mrf.mxu0  ;;  %6307 = vmatmul.mubr.msk.f32.gmra.mxu0 %vm421_vm1, %v8726_v51  ;;  %v1652_v27 = vadd.f32 %v7610_v1, %v7618_v12 }
 0x148   : > { %v1407_v39 = vadd.f32 %v6008_v48, %v7551_v16  ;;  %v7741_v42 = vadd.f32 %v1601_v21, %v1404_v33  ;;  %6309 = vmatprep.mubr.msk.f32.mxu0 %vm421_vm1, %v8727_v38  ;;  %v6061_v36 = vpop.f32.mrf.mxu1 }
 0x149   : > { %v1343_v41 = vpop.f32.mrf.mxu0 }
 0x14a   : > { %v1406_v15 = vadd.f32 %v1343_v41, %v969_v58  ;;  %v7747_v29 = vadd.f32 %v6058_v49, %v1407_v39  ;;  %v1621_v8 = vpop.f32.mrf.mxu1 }
 0x14b   : > { %v6011_v3 = vpop.f32.mrf.mxu0  ;;  %6310 = vmatmul.mubr.msk.f32.gmra.mxu0 %vm421_vm1, %v7212_v19 }
 0x14c   : > { %v1409_v16 = vadd.f32 %v6011_v3, %v7567_v18  ;;  %v7754_v35 = vadd.f32 %v1611_v9, %v1406_v15  ;;  %6312 = vmatprep.mubr.msk.f32.mxu0 %vm421_vm1, %v7347_v17  ;;  %v6064_v60 = vpop.f32.mrf.mxu1  ;;  %v1650_v15 = vadd.f32 %v7598_v46, %v7606_v6 }
 0x14d   : > { %v1353_v21 = vpop.f32.mrf.mxu0 }
 0x14e   : > { %v1408_v49 = vadd.f32 %v1353_v21, %v979_v40  ;;  %v7760_v44 = vadd.f32 %v6061_v36, %v1409_v16  ;;  %v1631_v19 = vpop.f32.mrf.mxu1 }
 0x14f   : > { %v6014_v33 = vpop.f32.mrf.mxu0  ;;  %6313 = vmatmul.mubr.msk.f32.gmra.mxu0 %vm421_vm1, %v7361_v63  ;;  %v999_v63 = vadd.f32 %v7588_v32, %v7596_v0 }
 0x150   : > { %v1411_v18 = vadd.f32 %v6014_v33, %v7581_v20  ;;  %v7767_v17 = vadd.f32 %v1621_v8, %v1408_v49  ;;  %6315 = vmatprep.mubr.msk.f32.mxu0 %vm421_vm1, %v2767_v52  ;;  %v6067_v5 = vpop.f32.mrf.mxu1 }
 0x151   : > { %v1363_v9 = vpop.f32.mrf.mxu0 }
 0x152   : > { %v1410_v48 = vadd.f32 %v1363_v9, %v989_v24  ;;  %v7771_v51 = vadd.f32 %v6064_v60, %v1411_v18  ;;  %v1641_v58 = vpop.f32.mrf.mxu1  ;;  %v1654_v24 = vadd.f32 %v7622_v31, %v7630_v28 }
 0x153   : > { %v6017_v39 = vpop.f32.mrf.mxu0  ;;  %6316 = vmatmul.mubr.msk.f32.gmra.mxu0 %vm421_vm1, %v2769_v47 }
 0x154   : > { %v1413_v13 = vadd.f32 %v6017_v39, %v7592_v62  ;;  %v7777_v20 = vadd.f32 %v1631_v19, %v1410_v48  ;;  %v6122_v45 = vpop.f32.mrf.mxu1 }
 0x155   : > { %v1373_v38 = vpop.f32.mrf.mxu0 }
 0x156   : > { %v1412_v36 = vadd.f32 %v1373_v38, %v999_v63  ;;  %v7779_v61 = vadd.f32 %v6067_v5, %v1413_v13  ;;  %v2034_v41 = vpop.f32.mrf.mxu1 }
 0x157   : > { %v6072_v22 = vpop.f32.mrf.mxu0 }
 0x158   : > { %v7783_v8 = vadd.f32 %v1641_v58, %v1412_v36  ;;  %v1923_v3 = vadd.f32 %v6072_v22, %v7608_v57  ;;  %v6125_v40 = vpop.f32.mrf.mxu1  ;;  %v1656_v58 = vadd.f32 %v7634_v14, %v7642_v30  ;;  %v1658_v36 = vadd.f32 %v7646_v2, %v7654_v26 }
 0x159   : > { %v1763_v32 = vpop.f32.mrf.mxu0 }
 0x15a   : > { %v1922_v0 = vadd.f32 %v1763_v32, %v1650_v15  ;;  %v7786_v62 = vadd.f32 %v6122_v45, %v1923_v3  ;;  %v2044_v16 = vpop.f32.mrf.mxu1  ;;  %v8728_v32 = vld [vmem:[#allocation2_spill] sm:$0xff] }
 0x15b   : > { %v6075_v60 = vpop.f32.mrf.mxu0 }
 0x15c   : > { %v1925_v21 = vadd.f32 %v6075_v60, %v7620_v43  ;;  %v7791_v52 = vadd.f32 %v2034_v41, %v1922_v0  ;;  %v6128_v49 = vpop.f32.mrf.mxu1  ;;  %v1660_v0 = vadd.f32 %v8728_v32, %v7666_v11 }
 0x15d   : > { %v1773_v46 = vpop.f32.mrf.mxu0 }
 0x15e   : > { %v1924_v6 = vadd.f32 %v1773_v46, %v1652_v27  ;;  %v7793_v19 = vadd.f32 %v6125_v40, %v1925_v21  ;;  %v2054_v57 = vpop.f32.mrf.mxu1  ;;  %v8729_v46 = vld [vmem:[#allocation3_spill] sm:$0xff] }
 0x15f   : > { %v6078_v33 = vpop.f32.mrf.mxu0 }
 0x160   : > { %v1927_v18 = vadd.f32 %v6078_v33, %v7632_v34  ;;  %v7798_v47 = vadd.f32 %v2044_v16, %v1924_v6  ;;  %v6131_v5 = vpop.f32.mrf.mxu1  ;;  %v1662_v6 = vadd.f32 %v8729_v46, %v7678_v4 }
 0x161   : > { %v1783_v1 = vpop.f32.mrf.mxu0 }
 0x162   : > { %v1926_v12 = vadd.f32 %v1783_v1, %v1654_v24  ;;  %v7800_v43 = vadd.f32 %v6128_v49, %v1927_v18  ;;  %v2064_v9 = vpop.f32.mrf.mxu1 }
 0x163   : > { %v6081_v48 = vpop.f32.mrf.mxu0 }
 0x164   : > { %v1929_v39 = vadd.f32 %v6081_v48, %v7644_v10  ;;  %v7805_v63 = vadd.f32 %v2054_v57, %v1926_v12  ;;  %v6134_v13 = vpop.f32.mrf.mxu1  ;;  %v8730_v57 = vld [vmem:[#allocation4_spill] sm:$0xff] }
 0x165   : > { %v1793_v31 = vpop.f32.mrf.mxu0 }
 0x166   : > { %v1928_v28 = vadd.f32 %v1793_v31, %v1656_v58  ;;  %v7807_v34 = vadd.f32 %v6131_v5, %v1929_v39  ;;  %v2074_v45 = vpop.f32.mrf.mxu1 }
 0x167   : > { %v6084_v38 = vpop.f32.mrf.mxu0 }
 0x168   : > { %v1931_v41 = vadd.f32 %v6084_v38, %v7656_v54  ;;  %v7812_v22 = vadd.f32 %v2064_v9, %v1928_v28  ;;  %v6137_v15 = vpop.f32.mrf.mxu1  ;;  %v8731_v9 = vld [vmem:[#allocation5_spill] sm:$0xff] }
 0x169   : > { %v1803_v14 = vpop.f32.mrf.mxu0  ;;  %v1664_v48 = vadd.f32 %v8731_v9, %v7690_v37 }
 0x16a   : > { %v1930_v30 = vadd.f32 %v1803_v14, %v1658_v36  ;;  %v7814_v10 = vadd.f32 %v6134_v13, %v1931_v41  ;;  %v2084_v3 = vpop.f32.mrf.mxu1  ;;  %v8732_v36 = vld [vmem:[#allocation7_spill] sm:$0xff] }
 0x16b   : > { %v6087_v40 = vpop.f32.mrf.mxu0 }
 0x16c   : > { %v1933_v16 = vadd.f32 %v6087_v40, %v7668_v55  ;;  %v7819_v60 = vadd.f32 %v2074_v45, %v1930_v30  ;;  %v6140_v27 = vpop.f32.mrf.mxu1 }
 0x16d   : > { %v1813_v2 = vpop.f32.mrf.mxu0 }
 0x16e   : > { %v1932_v26 = vadd.f32 %v1813_v2, %v1660_v0  ;;  %v7821_v54 = vadd.f32 %v6137_v15, %v1933_v16  ;;  %v2094_v21 = vpop.f32.mrf.mxu1 }
 0x16f   : > { %v6090_v49 = vpop.f32.mrf.mxu0 }
 0x170   : > { %v1935_v33 = vadd.f32 %v6090_v49, %v8730_v57  ;;  %v7826_v24 = vadd.f32 %v2084_v3, %v1932_v26  ;;  %v6143_v18 = vpop.f32.mrf.mxu1 }
 0x171   : > { %v1823_v11 = vpop.f32.mrf.mxu0 }
 0x172   : > { %v1934_v5 = vadd.f32 %v1823_v11, %v1662_v6  ;;  %v7828_v55 = vadd.f32 %v6140_v27, %v1935_v33  ;;  %v2104_v1 = vpop.f32.mrf.mxu1 }
 0x173   : > { %v6093_v12 = vpop.f32.mrf.mxu0 }
 0x174   : > { %v1937_v58 = vadd.f32 %v6093_v12, %v7692_v53  ;;  %v7833_v39 = vadd.f32 %v2094_v21, %v1934_v5  ;;  %v6146_v13 = vpop.f32.mrf.mxu1 }
 0x175   : > { %v1833_v4 = vpop.f32.mrf.mxu0 }
 0x176   : > { %v1936_v31 = vadd.f32 %v1833_v4, %v1664_v48  ;;  %v7835_v28 = vadd.f32 %v6143_v18, %v1937_v58  ;;  %v2114_v45 = vpop.f32.mrf.mxu1 }
 0x177   : > { %v6096_v38 = vpop.f32.mrf.mxu0 }
 0x178   : > { %v1939_v41 = vadd.f32 %v6096_v38, %v8732_v36  ;;  %v7838_v15 = vadd.f32 %v2104_v1, %v1936_v31  ;;  %v6149_v14 = vpop.f32.mrf.mxu1 }
 0x179   : > { %v1843_v30 = vpop.f32.mrf.mxu0 }
 0x17a   : > { %v1938_v3 = vadd.f32 %v1843_v30, %v7708_v56  ;;  %v7841_v37 = vadd.f32 %v6146_v13, %v1939_v41  ;;  %v2124_v53 = vpop.f32.mrf.mxu1 }
 0x17b   : > { %v6099_v40 = vpop.f32.mrf.mxu0 }
 0x17c   : > { %v1941_v32 = vadd.f32 %v6099_v40, %v7712_v59  ;;  %v7844_v0 = vadd.f32 %v2114_v45, %v1938_v3  ;;  %v6152_v16 = vpop.f32.mrf.mxu1 }
 0x17d   : > { %v1853_v27 = vpop.f32.mrf.mxu0 }
 0x17e   : > { %v1940_v2 = vadd.f32 %v1853_v27, %v7719_v7  ;;  %v7847_v26 = vadd.f32 %v6149_v14, %v1941_v32  ;;  %v2134_v21 = vpop.f32.mrf.mxu1 }
 0x17f   : > { %v6102_v49 = vpop.f32.mrf.mxu0 }
 0x180   : > { %v1943_v46 = vadd.f32 %v6102_v49, %v7723_v25  ;;  %v7850_v6 = vadd.f32 %v2124_v53, %v1940_v2  ;;  %v6155_v56 = vpop.f32.mrf.mxu1 }
 0x181   : > { %v1863_v57 = vpop.f32.mrf.mxu0 }
 0x182   : > { %v1942_v33 = vadd.f32 %v1863_v57, %v7730_v23  ;;  %v7853_v18 = vadd.f32 %v6152_v16, %v1943_v46  ;;  %v2144_v59 = vpop.f32.mrf.mxu1 }
 0x183   : > { %v6105_v11 = vpop.f32.mrf.mxu0 }
 0x184   : > { %v1945_v5 = vadd.f32 %v6105_v11, %v7734_v50  ;;  %v7856_v1 = vadd.f32 %v2134_v21, %v1942_v33  ;;  %v6158_v7 = vpop.f32.mrf.mxu1 }
 0x185   : > { %v1873_v12 = vpop.f32.mrf.mxu0 }
 0x186   : > { %v1944_v9 = vadd.f32 %v1873_v12, %v7741_v42  ;;  %v7859_v48 = vadd.f32 %v6155_v56, %v1945_v5  ;;  %v2154_v25 = vpop.f32.mrf.mxu1 }
 0x187   : > { %v6108_v58 = vpop.f32.mrf.mxu0 }
 0x188   : > { %v1947_v13 = vadd.f32 %v6108_v58, %v7747_v29  ;;  %v7862_v4 = vadd.f32 %v2144_v59, %v1944_v9  ;;  %v6161_v23 = vpop.f32.mrf.mxu1 }
 0x189   : > { %v1883_v31 = vpop.f32.mrf.mxu0 }
 0x18a   : > { %v1946_v45 = vadd.f32 %v1883_v31, %v7754_v35  ;;  %v7865_v38 = vadd.f32 %v6158_v7, %v1947_v13  ;;  %v2164_v50 = vpop.f32.mrf.mxu1 }
 0x18b   : > { %v6111_v36 = vpop.f32.mrf.mxu0 }
 0x18c   : > { %v1949_v41 = vadd.f32 %v6111_v36, %v7760_v44  ;;  %v7868_v14 = vadd.f32 %v2154_v25, %v1946_v45  ;;  %v6164_v42 = vpop.f32.mrf.mxu1 }
 0x18d   : > { %v1893_v30 = vpop.f32.mrf.mxu0 }
 0x18e   : > { %v1948_v3 = vadd.f32 %v1893_v30, %v7767_v17  ;;  %v7871_v53 = vadd.f32 %v6161_v23, %v1949_v41  ;;  %v2174_v29 = vpop.f32.mrf.mxu1 }
 0x18f   : > { %v6114_v40 = vpop.f32.mrf.mxu0 }
 0x190   : > { %v1951_v32 = vadd.f32 %v6114_v40, %v7771_v51  ;;  %v7874_v16 = vadd.f32 %v2164_v50, %v1948_v3  ;;  %v6167_v35 = vpop.f32.mrf.mxu1 }
 0x191   : > { %v1903_v27 = vpop.f32.mrf.mxu0 }
 0x192   : > { %v1950_v2 = vadd.f32 %v1903_v27, %v7777_v20  ;;  %v7877_v21 = vadd.f32 %v6164_v42, %v1951_v32  ;;  %v7879_v44 = vpop.f32.mrf.mxu1  ;;  %v8609_v27 = vmov 0.0  }
 0x193   : > { %v6117_v49 = vpop.f32.mrf.mxu0  ;;  %3745 = vmatprep.mubr.f32.mxu1 %v8609_v27 }
 0x194   : > { %v1953_v46 = vadd.f32 %v6117_v49, %v7779_v61  ;;  %v7882_v17 = vadd.f32 %v2174_v29, %v1950_v2  ;;  %v6222_v56 = vpop.f32.mrf.mxu1 }
 0x195   : > { %v1913_v57 = vpop.f32.mrf.mxu0 }
 0x196   : > { %v7885_v33 = vadd.f32 %v1913_v57, %v7783_v8  ;;  %v7887_v51 = vadd.f32 %v6167_v35, %v1953_v46  ;;  %v7889_v59 = vpop.f32.mrf.mxu1 }
 0x197   : > { %v6172_v11 = vpop.f32.mrf.mxu0 }
 0x198   : > { %v2462_v20 = vadd.f32 %v6172_v11, %v7786_v62  ;;  %v6225_v5 = vpop.f32.mrf.mxu1 }
 0x199   : > { %v2302_v7 = vpop.f32.mrf.mxu0 }
 0x19a   : > { %v7893_v12 = vadd.f32 %v2302_v7, %v7791_v52  ;;  %v7895_v61 = vadd.f32 %v6222_v56, %v2462_v20  ;;  %v7897_v9 = vpop.f32.mrf.mxu1 }
 0x19b   : > { %v6175_v25 = vpop.f32.mrf.mxu0 }
 0x19c   : > { %v2464_v8 = vadd.f32 %v6175_v25, %v7793_v19  ;;  %v6228_v58 = vpop.f32.mrf.mxu1 }
 0x19d   : > { %v2312_v13 = vpop.f32.mrf.mxu0 }
 0x19e   : > { %v7901_v23 = vadd.f32 %v2312_v13, %v7798_v47  ;;  %v7903_v31 = vadd.f32 %v6225_v5, %v2464_v8  ;;  %v7905_v62 = vpop.f32.mrf.mxu1 }
 0x19f   : > { %v6178_v45 = vpop.f32.mrf.mxu0 }
 0x1a0   : > { %v2466_v52 = vadd.f32 %v6178_v45, %v7800_v43  ;;  %v6231_v50 = vpop.f32.mrf.mxu1 }
 0x1a1   : > { %v2322_v36 = vpop.f32.mrf.mxu0 }
 0x1a2   : > { %v7909_v41 = vadd.f32 %v2322_v36, %v7805_v63  ;;  %v7911_v42 = vadd.f32 %v6228_v58, %v2466_v52  ;;  %v7913_v19 = vpop.f32.mrf.mxu1 }
 0x1a3   : > { %v6181_v30 = vpop.f32.mrf.mxu0 }
 0x1a4   : > { %v2468_v47 = vadd.f32 %v6181_v30, %v7807_v34  ;;  %v6234_v32 = vpop.f32.mrf.mxu1 }
 0x1a5   : > { %v2332_v3 = vpop.f32.mrf.mxu0 }
 0x1a6   : > { %v7917_v29 = vadd.f32 %v2332_v3, %v7812_v22  ;;  %v7919_v40 = vadd.f32 %v6231_v50, %v2468_v47  ;;  %v7928_v34 = vpop.f32.mrf.mxu1 }
 0x1a7   : > { %v6184_v43 = vpop.f32.mrf.mxu0 }
 0x1a8   : > { %v2470_v35 = vadd.f32 %v6184_v43, %v7814_v10  ;;  %v7936_v10 = vpop.f32.mrf.mxu1 }
 0x1a9   : > { %v2342_v63 = vpop.f32.mrf.mxu0 }
 0x1aa   : > { %v7924_v2 = vadd.f32 %v2342_v63, %v7819_v60  ;;  %v7926_v49 = vadd.f32 %v6234_v32, %v2470_v35  ;;  %v7941_v5 = vpop.f32.mrf.mxu1 }
 0x1ab   : > { %v6187_v46 = vpop.f32.mrf.mxu0 }
 0x1ac   : > { %v7931_v22 = vadd.f32 %v6187_v46, %v7821_v54  ;;  %v7949_v58 = vpop.f32.mrf.mxu1 }
 0x1ad   : > { %v2352_v56 = vpop.f32.mrf.mxu0 }
 0x1ae   : > { %v7934_v57 = vadd.f32 %v2352_v56, %v7826_v24  ;;  %v7957_v52 = vpop.f32.mrf.mxu1 }
 0x1af   : > { %v6190_v11 = vpop.f32.mrf.mxu0 }
 0x1b0   : > { %v7939_v20 = vadd.f32 %v6190_v11, %v7828_v55  ;;  %v7965_v30 = vpop.f32.mrf.mxu1 }
 0x1b1   : > { %v2362_v60 = vpop.f32.mrf.mxu0 }
 0x1b2   : > { %v7944_v7 = vadd.f32 %v2362_v60, %v7833_v39  ;;  %v7973_v32 = vpop.f32.mrf.mxu1 }
 0x1b3   : > { %v6193_v25 = vpop.f32.mrf.mxu0 }
 0x1b4   : > { %v7947_v54 = vadd.f32 %v6193_v25, %v7835_v28  ;;  %v7981_v63 = vpop.f32.mrf.mxu1 }
 0x1b5   : > { %v2372_v8 = vpop.f32.mrf.mxu0 }
 0x1b6   : > { %v7952_v24 = vadd.f32 %v2372_v8, %v7838_v15  ;;  %v7989_v11 = vpop.f32.mrf.mxu1 }
 0x1b7   : > { %v6196_v13 = vpop.f32.mrf.mxu0 }
 0x1b8   : > { %v7955_v55 = vadd.f32 %v6196_v13, %v7841_v37  ;;  %v7997_v8 = vpop.f32.mrf.mxu1 }
 0x1b9   : > { %v2382_v45 = vpop.f32.mrf.mxu0 }
 0x1ba   : > { %v7960_v39 = vadd.f32 %v2382_v45, %v7844_v0 }
 0x1bb   : > { %v6199_v50 = vpop.f32.mrf.mxu0 }
 0x1bc   : > { %v7963_v28 = vadd.f32 %v6199_v50, %v7847_v26  ;;  %v8005_v50 = vpop.f32.mrf.mxu1 }
 0x1bd   : > { %v2392_v36 = vpop.f32.mrf.mxu0 }
 0x1be   : > { %v7968_v15 = vadd.f32 %v2392_v36, %v7850_v6 }
 0x1bf   : > { %v6202_v47 = vpop.f32.mrf.mxu0 }
 0x1c0   : > { %v7971_v37 = vadd.f32 %v6202_v47, %v7853_v18 }
 0x1c1   : > { %v2402_v3 = vpop.f32.mrf.mxu0 }
 0x1c2   : > { %v7976_v0 = vadd.f32 %v2402_v3, %v7856_v1  ;;  %v8015_v3 = vpop.f32.mrf.mxu1 }
 0x1c3   : > { %v6205_v43 = vpop.f32.mrf.mxu0 }
 0x1c4   : > { %v7979_v26 = vadd.f32 %v6205_v43, %v7859_v48 }
 0x1c5   : > { %v2412_v35 = vpop.f32.mrf.mxu0 }
 0x1c6   : > { %v7984_v6 = vadd.f32 %v2412_v35, %v7862_v4 }
 0x1c7   : > { %v6208_v46 = vpop.f32.mrf.mxu0 }
 0x1c8   : > { %v7987_v18 = vadd.f32 %v6208_v46, %v7865_v38  ;;  %v8020_v46 = vpop.f32.mrf.mxu1 }
 0x1c9   : > { %v2422_v56 = vpop.f32.mrf.mxu0 }
 0x1ca   : > { %v7992_v1 = vadd.f32 %v2422_v56, %v7868_v14  ;;  %v8025_v27 = vpop.f32.mrf.mxu1 }
 0x1cb   : > { %v6211_v60 = vpop.f32.mrf.mxu0 }
 0x1cc   : > { %v7995_v48 = vadd.f32 %v6211_v60, %v7871_v53  ;;  %v2735_v60 = vadd.f32 %v7897_v9, %v7901_v23  ;;  %v2737_v9 = vadd.f32 %v7905_v62, %v7909_v41 }
 0x1cd   : > { %v2432_v25 = vpop.f32.mrf.mxu0 }
 0x1ce   : > { %v8000_v4 = vadd.f32 %v2432_v25, %v7874_v16  ;;  %v6429_v25 = vmov 1966171168  }
 0x1cf   : > { %v6214_v13 = vpop.f32.mrf.mxu0 }
 0x1d0   : > { %v8003_v38 = vadd.f32 %v6214_v13, %v7877_v21  ;;  %v2733_v21 = vadd.f32 %v7889_v59, %v7893_v12  ;;  %v3110_v13 = vunpack.c.l.s4 %v6429_v25  ;;  %v8032_v25 = vpop.f32.mrf.mxu1 }
 0x1d1   : > { %v2442_v45 = vpop.f32.mrf.mxu0 }
 0x1d2   : > { %8733 = vst [vmem:[#allocation8_spill] sm:$0xff] %v8003_v38  ;;  %v8008_v14 = vadd.f32 %v2442_v45, %v7882_v17  ;;  %v3112_v45 = vlaneseq  ;;  %v3111_v23 = vunpack.c.0.s8 %v3110_v13  ;;  %v8040_v62 = vpop.f32.mrf.mxu1 }
 0x1d3   : > { %v6217_v36 = vpop.f32.mrf.mxu0 }
 0x1d4   : > { %8734 = vst [vmem:[#allocation10_spill] sm:$0xff] %v8008_v14  ;;  %v8011_v53 = vadd.f32 %v6217_v36, %v7887_v51 }
 0x1d5   : > { %v8013_v47 = vpop.f32.mrf.mxu0 }
 0x1d6   : > { %8735 = vst [vmem:[#allocation11_spill] sm:$0xff] %v8011_v53  ;;  %8736 = vst [vmem:[#allocation13_spill] sm:$0xff] %v8013_v47 }
 0x1d7   : > { %v6272_v16 = vpop.f32.mrf.mxu0 }
 0x1d8   : > { %v3005_v43 = vadd.f32 %v6272_v16, %v7895_v61 }
 0x1d9   : > { %v2845_v35 = vpop.f32.mrf.mxu0 }
 0x1da   : > { %v3004_v56 = vadd.f32 %v2845_v35, %v2733_v21  ;;  %v3037_v61 = vmax.f32 %v3005_v43, 0.0 }
 0x1db   : > { %v6275_v17 = vpop.f32.mrf.mxu0 }
 0x1dc   : > { %v3007_v51 = vadd.f32 %v6275_v17, %v7903_v31  ;;  %v3036_v59 = vmax.f32 %v3004_v56, 0.0  ;;  %v8030_v31 = vshrl.u32 %v3112_v45, 7  ;;  %v2739_v56 = vadd.f32 %v7913_v19, %v7917_v29 }
 0x1dd   : > { %v2855_v36 = vpop.f32.mrf.mxu0  ;;  %v8045_v19 = vadd.f32 %v7879_v44, %v7885_v33  ;;  %v2741_v29 = vadd.f32 %v7928_v34, %v7924_v2  ;;  %v2744_v44 = vadd.f32 %v7936_v10, %v7931_v22  ;;  %v2743_v33 = vadd.f32 %v7941_v5, %v7934_v57 }
 0x1de   : > { %v3039_v16 = vmax.f32 %v3007_v51, 0.0  ;;  %v3006_v53 = vadd.f32 %v2855_v36, %v2735_v60 }
 0x1df   : > { %v6278_v12 = vpop.f32.mrf.mxu0 }
 0x1e0   : > { %v3237_v14 = vcombine.low %v3037_v61, %v3039_v16  ;;  %v3238_v38 = vcombine.high %v3037_v61, %v3039_v16  ;;  %v3038_v21 = vmax.f32 %v3006_v53, 0.0  ;;  %v3009_v35 = vadd.f32 %v6278_v12, %v7911_v42 }
 0x1e1   : > { %v2865_v17 = vpop.f32.mrf.mxu0  ;;  %v8038_v42 = vsub.s32 %v3111_v23, %v8030_v31 }
 0x1e2   : > { %v3101_v47 = vcombine.low %v3036_v59, %v3038_v21  ;;  %v3102_v43 = vcombine.high %v3036_v59, %v3038_v21  ;;  %v3008_v51 = vadd.f32 %v2865_v17, %v2737_v9  ;;  %v3041_v41 = vmax.f32 %v3009_v35, 0.0  ;;  %v2694_v17 = vpop.f32.mrf.mxu1 }
 0x1e3   : > { %v6281_v60 = vpop.f32.mrf.mxu0  ;;  %v8053_v35 = vrot.slane %v3238_v38, %v8038_v42 }
 0x1e4   : > { %v3011_v53 = vadd.f32 %v6281_v60, %v7919_v40  ;;  %v3040_v61 = vmax.f32 %v3008_v51, 0.0  ;;  %v8050_v40 = vrot.slane %v3237_v14, %v8038_v42  ;;  %v8064_v2 = vrot.slane %v3101_v47, %v8038_v42 }
 0x1e5   : > { %v2875_v36 = vpop.f32.mrf.mxu0  ;;  %v3122_v22 = vrot.slane %v3102_v43, %v8038_v42 }
 0x1e6   : > { %v3043_v13 = vmax.f32 %v3011_v53, 0.0  ;;  %v3010_v45 = vadd.f32 %v2875_v36, %v2739_v56 }
 0x1e7   : > { %v6284_v16 = vpop.f32.mrf.mxu0 }
 0x1e8   : > { %v3239_v12 = vcombine.low %v3041_v41, %v3043_v13  ;;  %v3240_v59 = vcombine.high %v3041_v41, %v3043_v13  ;;  %v3042_v21 = vmax.f32 %v3010_v45, 0.0  ;;  %v3013_v9 = vadd.f32 %v6284_v16, %v7926_v49  ;;  %v6261_v16 = vpop.f32.mrf.mxu1 }
 0x1e9   : > { %v2885_v23 = vpop.f32.mrf.mxu0  ;;  %v2746_v13 = vadd.f32 %v7949_v58, %v7939_v20  ;;  %v2745_v45 = vadd.f32 %v7957_v52, %v7944_v7  ;;  %v2747_v20 = vadd.f32 %v7973_v32, %v7952_v24  ;;  %v2750_v7 = vadd.f32 %v7981_v63, %v7955_v55 }
 0x1ea   : > { %v3265_v51 = vrot.slane %v3239_v12, %v8038_v42  ;;  %v8057_v60 = vrot.slane %v3240_v59, %v8038_v42  ;;  %v3103_v49 = vcombine.low %v3040_v61, %v3042_v21  ;;  %v3104_v56 = vcombine.high %v3040_v61, %v3042_v21 }
 0x1eb   : > { %v3012_v34 = vadd.f32 %v2885_v23, %v2741_v29  ;;  %v6287_v38 = vpop.f32.mrf.mxu0  ;;  %v2748_v61 = vadd.f32 %v7965_v30, %v7947_v54  ;;  %v2749_v54 = vadd.f32 %v7989_v11, %v7960_v39  ;;  %v2752_v58 = vadd.f32 %v7997_v8, %v7963_v28  ;;  %v2704_v30 = vpop.f32.mrf.mxu1 }
 0x1ec   : > { %v3301_v14 = vcombine.low %v8050_v40, %v3265_v51  ;;  %v3302_v53 = vcombine.high %v8050_v40, %v3265_v51  ;;  %v3303_v36 = vcombine.low %v8053_v35, %v8057_v60  ;;  %v3304_v41 = vcombine.high %v8053_v35, %v8057_v60 }
 0x1ed   : > { %v3129_v10 = vrot.slane %v3103_v49, %v8038_v42  ;;  %v3136_v57 = vrot.slane %v3104_v56, %v8038_v42  ;;  %v3015_v5 = vadd.f32 %v6287_v38, %v2744_v44  ;;  %v2895_v47 = vpop.f32.mrf.mxu0  ;;  %v3045_v35 = vmax.f32 %v3013_v9, 0.0 }
 0x1ee   : > { %v3014_v12 = vadd.f32 %v2895_v47, %v2743_v33  ;;  %v3044_v23 = vmax.f32 %v3012_v34, 0.0  ;;  %v2751_v33 = vadd.f32 %v8005_v50, %v7968_v15  ;;  %v2754_v24 = vadd.f32 %v8015_v3, %v7971_v37 }
 0x1ef   : > { %v3165_v59 = vcombine.low %v8064_v2, %v3129_v10  ;;  %v3166_v43 = vcombine.high %v8064_v2, %v3129_v10  ;;  %v3167_v21 = vcombine.low %v3122_v22, %v3136_v57  ;;  %v3168_v29 = vcombine.high %v3122_v22, %v3136_v57  ;;  %v6290_v40 = vpop.f32.mrf.mxu0 }
 0x1f0   : > { %v3047_v51 = vmax.f32 %v3015_v5, 0.0  ;;  %v3046_v60 = vmax.f32 %v3014_v12, 0.0  ;;  %v8097_v55 = vadd.f32 %v8020_v46, %v7976_v0  ;;  %v3017_v39 = vadd.f32 %v6290_v40, %v2746_v13 }
 0x1f1   : > { %v2905_v52 = vpop.f32.mrf.mxu0  ;;  %v8101_v28 = vadd.f32 %v8025_v27, %v7979_v26  ;;  %v8105_v63 = vadd.f32 %v8032_v25, %v7984_v6  ;;  %v8109_v15 = vadd.f32 %v8040_v62, %v7987_v18  ;;  %v8112_v37 = vadd.f32 %v2694_v17, %v7992_v1 }
 0x1f2   : > { %v3241_v49 = vcombine.low %v3045_v35, %v3047_v51  ;;  %v3242_v56 = vcombine.high %v3045_v35, %v3047_v51  ;;  %v3105_v9 = vcombine.low %v3044_v23, %v3046_v60  ;;  %v3106_v44 = vcombine.high %v3044_v23, %v3046_v60 }
 0x1f3   : > { %v6293_v32 = vpop.f32.mrf.mxu0  ;;  %v3016_v11 = vadd.f32 %v2905_v52, %v2745_v45  ;;  %v8115_v0 = vadd.f32 %v6261_v16, %v7995_v48  ;;  %v8118_v8 = vadd.f32 %v2704_v30, %v8000_v4  ;;  %v8121_v50 = vrot.slane %v3301_v14, %v8038_v42 }
 0x1f4   : > { %v3019_v27 = vadd.f32 %v6293_v32, %v2748_v61  ;;  %v8124_v6 = vrot.slane %v3303_v36, %v8038_v42  ;;  %v8127_v3 = vrot.slane %v3302_v53, %v8038_v42  ;;  %v8130_v1 = vrot.slane %v3165_v59, %v8038_v42 }
 0x1f5   : > { %v2915_v26 = vpop.f32.mrf.mxu0  ;;  %v3049_v48 = vmax.f32 %v3017_v39, 0.0  ;;  %v8133_v4 = vrot.slane %v3304_v41, %v8038_v42  ;;  %v8136_v62 = vrot.slane %v3167_v21, %v8038_v42  ;;  %v3048_v17 = vmax.f32 %v3016_v11, 0.0 }
 0x1f6   : > { %v3018_v18 = vadd.f32 %v2915_v26, %v2747_v20  ;;  %v3051_v46 = vmax.f32 %v3019_v27, 0.0  ;;  %v8139_v34 = vrot.slane %v3166_v43, %v8038_v42  ;;  %v8142_v38 = vrot.slane %v3241_v49, %v8038_v42 }
 0x1f7   : > { %v6296_v25 = vpop.f32.mrf.mxu0  ;;  %v8145_v22 = vrot.slane %v3168_v29, %v8038_v42  ;;  %v8148_v41 = vrot.slane %v3242_v56, %v8038_v42  ;;  %v3143_v10 = vrot.slane %v3105_v9, %v8038_v42  ;;  %v3150_v12 = vrot.slane %v3106_v44, %v8038_v42 }
 0x1f8   : > { %v3050_v2 = vmax.f32 %v3018_v18, 0.0  ;;  %v3243_v14 = vcombine.low %v3049_v48, %v3051_v46  ;;  %v3244_v53 = vcombine.high %v3049_v48, %v3051_v46  ;;  %v3021_v45 = vadd.f32 %v6296_v25, %v2750_v7 }
 0x1f9   : > { %v2925_v36 = vpop.f32.mrf.mxu0 }
 0x1fa   : > { %v3107_v57 = vcombine.low %v3048_v17, %v3050_v2  ;;  %v3108_v5 = vcombine.high %v3048_v17, %v3050_v2  ;;  %v3293_v47 = vrot.slane %v3243_v14, %v8038_v42  ;;  %v3300_v13 = vrot.slane %v3244_v53, %v8038_v42 }
 0x1fb   : > { %v3020_v61 = vadd.f32 %v2925_v36, %v2749_v54  ;;  %v6299_v16 = vpop.f32.mrf.mxu0  ;;  %v3053_v52 = vmax.f32 %v3021_v45, 0.0 }
 0x1fc   : > { %v3157_v59 = vrot.slane %v3107_v57, %v8038_v42  ;;  %v3164_v43 = vrot.slane %v3108_v5, %v8038_v42  ;;  %v3023_v21 = vadd.f32 %v6299_v16, %v2752_v58  ;;  %v3305_v29 = vcombine.low %v8142_v38, %v3293_v47  ;;  %v6264_v57 = vpop.f32.mrf.mxu1 }
 0x1fd   : > { %v3306_v40 = vcombine.high %v8142_v38, %v3293_v47  ;;  %v3307_v35 = vcombine.low %v8148_v41, %v3300_v13  ;;  %v3308_v23 = vcombine.high %v8148_v41, %v3300_v13  ;;  %v2935_v51 = vpop.f32.mrf.mxu0  ;;  %v3052_v30 = vmax.f32 %v3020_v61, 0.0 }
 0x1fe   : > { %v3169_v60 = vcombine.low %v3143_v10, %v3157_v59  ;;  %v3170_v20 = vcombine.high %v3143_v10, %v3157_v59  ;;  %v3171_v7 = vcombine.low %v3150_v12, %v3164_v43  ;;  %v3172_v54 = vcombine.high %v3150_v12, %v3164_v43 }
 0x1ff   : > { %v3055_v49 = vmax.f32 %v3023_v21, 0.0  ;;  %v3022_v56 = vadd.f32 %v2935_v51, %v2751_v33  ;;  %v6302_v9 = vpop.f32.mrf.mxu0  ;;  %v8173_v33 = vrot.slane %v3305_v29, %v8038_v42  ;;  %v8181_v17 = vrot.slane %v3307_v35, %v8038_v42 }
 0x200   : > { %v8161_v58 = vrot.slane %v3169_v60, %v8038_v42  ;;  %v8164_v44 = vrot.slane %v3171_v7, %v8038_v42  ;;  %v3025_v39 = vadd.f32 %v6302_v9, %v2754_v24  ;;  %v8167_v32 = vrot.slane %v3170_v20, %v8038_v42 }
 0x201   : > { %v3509_v11 = vcombine.low %v3053_v52, %v3055_v49  ;;  %v3510_v27 = vcombine.high %v3053_v52, %v3055_v49  ;;  %v3054_v26 = vmax.f32 %v3022_v56, 0.0  ;;  %v2945_v18 = vpop.f32.mrf.mxu0  ;;  %v8170_v48 = vrot.slane %v3172_v54, %v8038_v42  ;;  %v2714_v54 = vpop.f32.mrf.mxu1 }
 0x202   : > { %v3024_v46 = vadd.f32 %v2945_v18, %v8097_v55  ;;  %v3233_v25 = vcombine.low %v8139_v34, %v8167_v32  ;;  %v3229_v24 = vcombine.low %v8130_v1, %v8161_v58  ;;  %v3057_v14 = vmax.f32 %v3025_v39, 0.0 }
 0x203   : > { %v3373_v2 = vcombine.low %v3052_v30, %v3054_v26  ;;  %v3374_v38 = vcombine.high %v3052_v30, %v3054_v26  ;;  %v6305_v53 = vpop.f32.mrf.mxu0  ;;  %v8184_v36 = vrot.slane %v3509_v11, %v8038_v42  ;;  %v3234_v55 = vcombine.high %v8139_v34, %v8167_v32  ;;  %v8740_v30 = vld [vmem:[#allocation11_spill] sm:$0xff] }
 0x204   : > { %v3027_v41 = vadd.f32 %v6305_v53, %v8101_v28  ;;  %v3230_v10 = vcombine.high %v8130_v1, %v8161_v58  ;;  %v8192_v5 = vrot.slane %v3510_v27, %v8038_v42  ;;  %v3056_v47 = vmax.f32 %v3024_v46, 0.0 }
 0x205   : > { %v2955_v13 = vpop.f32.mrf.mxu0  ;;  %v3235_v45 = vcombine.low %v8145_v22, %v8170_v48  ;;  %v3231_v61 = vcombine.low %v8136_v62, %v8164_v44  ;;  %v3236_v12 = vcombine.high %v8145_v22, %v8170_v48  ;;  %v3232_v59 = vcombine.high %v8136_v62, %v8164_v44 }
 0x206   : > { %v3059_v16 = vmax.f32 %v3027_v41, 0.0  ;;  %v3026_v28 = vadd.f32 %v2955_v13, %v8105_v63  ;;  %v8204_v21 = vrot.slane %v3306_v40, %v8038_v42  ;;  %v8211_v51 = vrot.slane %v3308_v23, %v8038_v42 }
 0x207   : > { %v6308_v43 = vpop.f32.mrf.mxu0  ;;  %v8214_v63 = vrot.slane %v3373_v2, %v8038_v42  ;;  %v8742_v1 = vcombine.low %v8121_v50, %v8173_v33  ;;  %v8744_v34 = vcombine.high %v8121_v50, %v8173_v33  ;;  %v8746_v58 = vcombine.low %v8124_v6, %v8181_v17 }
 0x208   : > { %v3511_v60 = vcombine.low %v3057_v14, %v3059_v16  ;;  %v3512_v20 = vcombine.high %v3057_v14, %v3059_v16  ;;  %v3058_v7 = vmax.f32 %v3026_v28, 0.0  ;;  %v3369_v40 = vcombine.low %v8127_v3, %v8204_v21 }
 0x209   : > { %v2965_v52 = vpop.f32.mrf.mxu0  ;;  %v3029_v27 = vadd.f32 %v6308_v43, %v8109_v15  ;;  %v3394_v15 = vrot.slane %v3374_v38, %v8038_v42  ;;  %v8743_v62 = vcombine.high %v8127_v3, %v8204_v21  ;;  %v8745_v22 = vcombine.low %v8133_v4, %v8211_v51 }
 0x20a   : > { %v3537_v56 = vrot.slane %v3511_v60, %v8038_v42  ;;  %v3544_v9 = vrot.slane %v3512_v20, %v8038_v42  ;;  %v3375_v39 = vcombine.low %v3056_v47, %v3058_v7  ;;  %v3376_v11 = vcombine.high %v3056_v47, %v3058_v7  ;;  %v6267_v47 = vpop.f32.mrf.mxu1  ;;  %v8737_v60 = vld [vmem:[#allocation13_spill] sm:$0xff] }
 0x20b   : > { %v3028_v26 = vadd.f32 %v2965_v52, %v8112_v37  ;;  %v6311_v18 = vpop.f32.mrf.mxu0  ;;  %v2491_v20 = vadd.f32 %v8737_v60, %v8045_v19  ;;  %v3061_v38 = vmax.f32 %v3029_v27, 0.0  ;;  %v2764_v29 = vadd.f32 %v6267_v47, %v8740_v30 }
 0x20c   : > { %v3573_v14 = vcombine.low %v8184_v36, %v3537_v56  ;;  %v3574_v53 = vcombine.high %v8184_v36, %v3537_v56  ;;  %v3575_v41 = vcombine.low %v8192_v5, %v3544_v9  ;;  %v3576_v13 = vcombine.high %v8192_v5, %v3544_v9  ;;  %v2724_v49 = vpop.f32.mrf.mxu1 }
 0x20d   : > { %v3401_v37 = vrot.slane %v3375_v39, %v8038_v42  ;;  %v3408_v16 = vrot.slane %v3376_v11, %v8038_v42  ;;  %v3031_v28 = vadd.f32 %v6311_v18, %v8115_v0  ;;  %v2975_v43 = vpop.f32.mrf.mxu0  ;;  %v3060_v2 = vmax.f32 %v3028_v26, 0.0  ;;  %v8738_v11 = vld [vmem:[#allocation8_spill] sm:$0xff]  ;;  %v8739_v0 = vld [vmem:[#allocation10_spill] sm:$0xff] }
 0x20e   : > { %v3030_v7 = vadd.f32 %v2975_v43, %v8118_v8  ;;  %v2762_v23 = vadd.f32 %v6264_v57, %v8738_v11  ;;  %v2761_v18 = vadd.f32 %v2714_v54, %v8739_v0  ;;  %v8252_v57 = vrot.slane %v3575_v41, %v8038_v42 }
 0x20f   : > { %v3437_v36 = vcombine.low %v8214_v63, %v3401_v37  ;;  %v3438_v52 = vcombine.high %v8214_v63, %v3401_v37  ;;  %v3439_v5 = vcombine.low %v3394_v15, %v3408_v16  ;;  %v3440_v56 = vcombine.high %v3394_v15, %v3408_v16  ;;  %v6314_v9 = vpop.f32.mrf.mxu0 }
 0x210   : > { %v3063_v39 = vmax.f32 %v3031_v28, 0.0  ;;  %v3062_v46 = vmax.f32 %v3030_v7, 0.0  ;;  %v3033_v63 = vadd.f32 %v6314_v9, %v2762_v23  ;;  %v2763_v15 = vadd.f32 %v2724_v49, %v2491_v20 }
 0x211   : > { %v2985_v35 = vpop.f32.mrf.mxu0  ;;  %v8249_v7 = vrot.slane %v3573_v14, %v8038_v42  ;;  %v8258_v30 = vrot.slane %v3576_v13, %v8038_v42  ;;  %v3465_v41 = vrot.slane %v3438_v52, %v8038_v42  ;;  %v3472_v47 = vrot.slane %v3440_v56, %v8038_v42 }
 0x212   : > { %v3513_v19 = vcombine.low %v3061_v38, %v3063_v39  ;;  %v3514_v60 = vcombine.high %v3061_v38, %v3063_v39  ;;  %v3377_v8 = vcombine.low %v3060_v2, %v3062_v46  ;;  %v3378_v43 = vcombine.high %v3060_v2, %v3062_v46 }
 0x213   : > { %v6317_v37 = vpop.f32.mrf.mxu0  ;;  %v3032_v16 = vadd.f32 %v2985_v35, %v2761_v18  ;;  %v3065_v54 = vmax.f32 %v3033_v63, 0.0  ;;  %v8255_v46 = vrot.slane %v3574_v53, %v8038_v42  ;;  %v8262_v35 = vrot.slane %v3439_v5, %v8038_v42 }
 0x214   : > { %v3035_v27 = vadd.f32 %v6317_v37, %v2764_v29  ;;  %v3451_v29 = vrot.slane %v3437_v36, %v8038_v42  ;;  %v3551_v20 = vrot.slane %v3513_v19, %v8038_v42  ;;  %v3558_v53 = vrot.slane %v3514_v60, %v8038_v42 }
 0x215   : > { %v2995_v26 = vpop.f32.mrf.mxu0  ;;  %v3064_v38 = vmax.f32 %v3032_v16, 0.0  ;;  %v3415_v36 = vrot.slane %v3377_v8, %v8038_v42  ;;  %v3422_v5 = vrot.slane %v3378_v43, %v8038_v42  ;;  %v8747_v50 = vcombine.high %v8133_v4, %v8211_v51 }
 0x216   : > { %v3034_v28 = vadd.f32 %v2995_v26, %v2763_v15  ;;  %v3067_v11 = vmax.f32 %v3035_v27, 0.0  ;;  %v8748_v3 = vcombine.high %v8124_v6, %v8181_v17 }
 0x218   : > { %v3066_v39 = vmax.f32 %v3034_v28, 0.0  ;;  %v3515_v49 = vcombine.low %v3065_v54, %v3067_v11  ;;  %v3516_v23 = vcombine.high %v3065_v54, %v3067_v11 }
 0x21a   : > { %v3379_v2 = vcombine.low %v3064_v38, %v3066_v39  ;;  %v3380_v14 = vcombine.high %v3064_v38, %v3066_v39  ;;  %v3565_v13 = vrot.slane %v3515_v49, %v8038_v42  ;;  %v3572_v9 = vrot.slane %v3516_v23, %v8038_v42 }
 0x21c   : > { %v3429_v0 = vrot.slane %v3379_v2, %v8038_v42  ;;  %v3436_v18 = vrot.slane %v3380_v14, %v8038_v42  ;;  %v3577_v63 = vcombine.low %v3551_v20, %v3565_v13  ;;  %v3578_v52 = vcombine.high %v3551_v20, %v3565_v13 }
 0x21d   : > { %v3579_v37 = vcombine.low %v3558_v53, %v3572_v9  ;;  %v3580_v56 = vcombine.high %v3558_v53, %v3572_v9 }
 0x21e   : > { %v3441_v15 = vcombine.low %v3415_v36, %v3429_v0  ;;  %v3442_v19 = vcombine.high %v3415_v36, %v3429_v0  ;;  %v3443_v16 = vcombine.low %v3422_v5, %v3436_v18  ;;  %v3444_v60 = vcombine.high %v3422_v5, %v3436_v18 }
 0x21f   : > { %v3615_v27 = vrot.slane %v3577_v63, %v8038_v42  ;;  %v8276_v26 = vrot.slane %v3579_v37, %v8038_v42  ;;  %v3629_v8 = vrot.slane %v3578_v52, %v8038_v42  ;;  %v8280_v43 = vrot.slane %v3580_v56, %v8038_v42 }
 0x220   : > { %v3479_v28 = vrot.slane %v3441_v15, %v8038_v42  ;;  %v3486_v54 = vrot.slane %v3443_v16, %v8038_v42  ;;  %v3493_v11 = vrot.slane %v3442_v19, %v8038_v42  ;;  %v3500_v38 = vrot.slane %v3444_v60, %v8038_v42 }
 0x221   : > { %v3641_v39 = vcombine.low %v8255_v46, %v3629_v8  ;;  %v3637_v49 = vcombine.low %v8249_v7, %v3615_v27  ;;  %v3642_v23 = vcombine.high %v8255_v46, %v3629_v8  ;;  %v3638_v2 = vcombine.high %v8249_v7, %v3615_v27 }
 0x222   : > { %v3505_v14 = vcombine.low %v3465_v41, %v3493_v11  ;;  %v3501_v20 = vcombine.low %v3451_v29, %v3479_v28  ;;  %v3506_v53 = vcombine.high %v3465_v41, %v3493_v11  ;;  %v3502_v13 = vcombine.high %v3451_v29, %v3479_v28  ;;  %v3068_v29 = vld [vmem:[%s8527_s2] sm:$0xff] }
 0x223   : > { %v3507_v9 = vcombine.low %v3472_v47, %v3500_v38  ;;  %v3503_v36 = vcombine.low %v8262_v35, %v3486_v54  ;;  %v3508_v5 = vcombine.high %v3472_v47, %v3500_v38  ;;  %v3504_v0 = vcombine.high %v8262_v35, %v3486_v54 }
 0x224   : > { %3709 = vmatprep.subr.mxu1 %v3505_v14  ;;  %v3643_v42 = vcombine.low %v8258_v30, %v8280_v43  ;;  %v3639_v18 = vcombine.low %v8252_v57, %v8276_v26  ;;  %v3644_v7 = vcombine.high %v8258_v30, %v8280_v43  ;;  %v3640_v46 = vcombine.high %v8252_v57, %v8276_v26 }
 0x225   : > { %3710 = vmatpush1.msra.mxu1 %v3501_v20  ;;  %v8741_v30 = vmov 0.0   ;;  %v6432_v57 = vmov 1934713408  }
 0x226   : > { %3711 = vmatprep.subr.mxu1 %v3233_v25  ;;  %v4316_v35 = vunpack.c.l.s4 %v6432_v57 }
 0x227   : > { %3712 = vmatpush1.msra.mxu1 %v3229_v24 }
 0x228   : > { %5528 = vmatmul.mubr.msk.f32.vlgmr.msra.gmra.mxu1 %vm3677_vm4, %v3068_v29  ;;  %3780 = vmatprep.subr.mxu1 %v3506_v53  ;;  %v4317_v60 = vunpack.c.0.s8 %v4316_v35 }
 0x229   : > { %3781 = vmatpush1.msra.mxu1 %v3502_v13  ;;  %3816 = vmatprep.mubr.f32.mxu1 %v8741_v30 }
 0x22a   : > { %3782 = vmatprep.subr.mxu1 %v3234_v55  ;;  %v8414_v14 = vsub.s32 %v4317_v60, %v8030_v31 }
 0x22b   : > { %3783 = vmatpush1.msra.mxu1 %v3230_v10  ;;  %v6431_v10 = vmov 1983009808  }
 0x22c   : > { %5529 = vmatmul.mubr.msk.f32.vlgmr.msra.gmra.mxu1 %vm3677_vm4, %v3068_v29  ;;  %3851 = vmatprep.subr.mxu1 %v3507_v9 }
 0x22d   : > { %3852 = vmatpush1.msra.mxu1 %v3503_v36  ;;  %3887 = vmatprep.mubr.f32.mxu1 %v8741_v30 }
 0x22e   : > { %3853 = vmatprep.subr.mxu1 %v3235_v45  ;;  %v4252_v45 = vunpack.c.l.s4 %v6431_v10 }
 0x22f   : > { %3854 = vmatpush1.msra.mxu1 %v3231_v61 }
 0x230   : > { %5530 = vmatmul.mubr.msk.f32.vlgmr.msra.gmra.mxu1 %vm3677_vm4, %v3068_v29  ;;  %3922 = vmatprep.subr.mxu1 %v3508_v5 }
 0x231   : > { %3923 = vmatpush1.msra.mxu1 %v3504_v0  ;;  %3958 = vmatprep.mubr.f32.mxu1 %v8741_v30 }
 0x232   : > { %3924 = vmatprep.subr.mxu1 %v3236_v12 }
 0x233   : > { %3925 = vmatpush1.msra.mxu1 %v3232_v59  ;;  %v4253_v59 = vunpack.c.0.s8 %v4252_v45 }
 0x234   : > { %5531 = vmatmul.mubr.msk.f32.vlgmr.msra.gmra.mxu1 %vm3677_vm4, %v3068_v29  ;;  %3993 = vmatprep.subr.mxu1 %v3641_v39 }
 0x235   : > { %3994 = vmatpush1.msra.mxu1 %v3637_v49  ;;  %4029 = vmatprep.mubr.f32.mxu1 %v8741_v30  ;;  %v8395_v47 = vsub.s32 %v4253_v59, %v8030_v31 }
 0x236   : > { %3995 = vmatprep.subr.mxu1 %v3369_v40 }
 0x237   : > { %3996 = vmatpush1.msra.mxu1 %v8742_v1 }
 0x238   : > { %5532 = vmatmul.mubr.msk.f32.vlgmr.msra.gmra.mxu1 %vm3677_vm4, %v3068_v29  ;;  %4064 = vmatprep.subr.mxu1 %v3642_v23 }
 0x239   : > { %4065 = vmatpush1.msra.mxu1 %v3638_v2  ;;  %4100 = vmatprep.mubr.f32.mxu1 %v8741_v30 }
 0x23a   : > { %4066 = vmatprep.subr.mxu1 %v8743_v62  ;;  %v4521_v62 = vld [vmem:[%s8528_s3] sm:$0xff] }
 0x23b   : > { %4067 = vmatpush1.msra.mxu1 %v8744_v34 }
 0x23c   : > { %5533 = vmatmul.mubr.msk.f32.vlgmr.msra.gmra.mxu1 %vm3677_vm4, %v3068_v29  ;;  %4135 = vmatprep.subr.mxu1 %v3643_v42 }
 0x23d   : > { %4136 = vmatpush1.msra.mxu1 %v3639_v18  ;;  %4171 = vmatprep.mubr.f32.mxu1 %v8741_v30 }
 0x23e   : > { %4137 = vmatprep.subr.mxu1 %v8745_v22 }
 0x23f   : > { %4138 = vmatpush1.msra.mxu1 %v8746_v58 }
 0x240   : > { %5534 = vmatmul.mubr.msk.f32.vlgmr.msra.gmra.mxu1 %vm3677_vm4, %v3068_v29  ;;  %4206 = vmatprep.subr.mxu1 %v3644_v7 }
 0x241   : > { %4207 = vmatpush1.msra.mxu1 %v3640_v46  ;;  %4242 = vmatprep.mubr.f32.mxu1 %v8741_v30 }
 0x242   : > { %4208 = vmatprep.subr.mxu1 %v8747_v50 }
 0x243   : > { %4209 = vmatpush1.msra.mxu1 %v8748_v3 }
 0x244   : > { %5535 = vmatmul.mubr.msk.f32.vlgmr.msra.gmra.mxu1 %vm3677_vm4, %v3068_v29  ;;  %6318 = vmatprep.subr.mxu1 %v8741_v30 }
 0x245   : > { %6322 = vmatprep.mubr.msk.f32.mxu1 %vm6430_vm5, %v8741_v30 }
 0x2e8   : > { %v8369_v44 = vpop.f32.mrf.mxu1 }
 0x2ea   : > { %v8371_v32 = vpop.f32.mrf.mxu1 }
 0x2ec   : > { %v8373_v48 = vpop.f32.mrf.mxu1 }
 0x2ed   : > { %v4249_v56 = vcombine.low %v8369_v44, %v8373_v48  ;;  %v4250_v34 = vcombine.high %v8369_v44, %v8373_v48 }
 0x2ee   : > { %v8375_v4 = vpop.f32.mrf.mxu1 }
 0x2ef   : > { %v4265_v63 = vcombine.low %v8371_v32, %v8375_v4  ;;  %v4257_v11 = vrot.slane %v4249_v56, %v8395_v47  ;;  %v4266_v22 = vcombine.high %v8371_v32, %v8375_v4 }
 0x2f0   : > { %v8377_v33 = vpop.f32.mrf.mxu1 }
 0x2f1   : > { %v4273_v8 = vrot.slane %v4265_v63, %v8395_v47  ;;  %v4280_v10 = vrot.slane %v4266_v22, %v8395_v47 }
 0x2f2   : > { %v8379_v6 = vpop.f32.mrf.mxu1 }
 0x2f3   : > { %v4313_v2 = vcombine.low %v4257_v11, %v4273_v8  ;;  %v4314_v58 = vcombine.high %v4257_v11, %v4273_v8 }
 0x2f4   : > { %v8381_v25 = vpop.f32.mrf.mxu1 }
 0x2f5   : > { %v4281_v52 = vcombine.low %v8377_v33, %v8381_v25  ;;  %v4321_v36 = vrot.slane %v4313_v2, %v8414_v14  ;;  %v4282_v50 = vcombine.high %v8377_v33, %v8381_v25  ;;  %v4328_v45 = vrot.slane %v4314_v58, %v8414_v14  ;;  %v4526_v2 = vld [vmem:[%s8528_s3 + $0x28] sm:$0xff] }
 0x2f6   : > { %v8383_v24 = vpop.f32.mrf.mxu1 }
 0x2f7   : > { %v4297_v51 = vcombine.low %v8379_v6, %v8383_v24  ;;  %v4289_v43 = vrot.slane %v4281_v52, %v8395_v47  ;;  %v4298_v18 = vcombine.high %v8379_v6, %v8383_v24 }
 0x2f8   : > { %v8385_v17 = vpop.f32.mrf.mxu1 }
 0x2f9   : > { %v4305_v19 = vrot.slane %v4297_v51, %v8395_v47  ;;  %v4312_v44 = vrot.slane %v4298_v18, %v8395_v47  ;;  %v4264_v51 = vrot.slane %v4250_v34, %v8395_v47 }
 0x2fa   : > { %v8387_v55 = vpop.f32.mrf.mxu1 }
 0x2fb   : > { %v4345_v38 = vcombine.low %v4289_v43, %v4305_v19  ;;  %v4346_v7 = vcombine.high %v4289_v43, %v4305_v19  ;;  %v4329_v63 = vcombine.low %v4264_v51, %v4280_v10  ;;  %v4524_v19 = vld [vmem:[%s8528_s3 + $0x18] sm:$0xff] }
 0x2fc   : > { %v8389_v61 = vpop.f32.mrf.mxu1 }
 0x2fd   : > { %v4385_v37 = vcombine.low %v8385_v17, %v8389_v61  ;;  %v4353_v53 = vrot.slane %v4345_v38, %v8414_v14  ;;  %v4386_v3 = vcombine.high %v8385_v17, %v8389_v61  ;;  %v4360_v48 = vrot.slane %v4346_v7, %v8414_v14  ;;  %v4522_v17 = vld [vmem:[%s8528_s3 + $0x8] sm:$0xff] }
 0x2fe   : > { %v4104_v12 = vpop.f32.mrf.mxu1  ;;  %v4296_v61 = vrot.slane %v4282_v50, %v8395_v47 }
 0x2ff   : > { %v4401_v40 = vcombine.low %v8387_v55, %v4104_v12  ;;  %v4393_v28 = vrot.slane %v4385_v37, %v8395_v47  ;;  %v4402_v46 = vcombine.high %v8387_v55, %v4104_v12  ;;  %v4377_v1 = vcombine.low %v4321_v36, %v4353_v53 }
 0x300   : > { %v4173_v21 = vpop.f32.mrf.mxu1  ;;  %v4378_v32 = vcombine.high %v4321_v36, %v4353_v53  ;;  %v4400_v12 = vrot.slane %v4386_v3, %v8395_v47  ;;  %v4379_v35 = vcombine.low %v4328_v45, %v4360_v48 }
 0x301   : > { %v4409_v16 = vrot.slane %v4401_v40, %v8395_v47  ;;  %v4416_v4 = vrot.slane %v4402_v46, %v8395_v47  ;;  %v4361_v40 = vcombine.low %v4296_v61, %v4312_v44 }
 0x302   : > { %v4175_v41 = vpop.f32.mrf.mxu1 }
 0x303   : > { %v4449_v39 = vcombine.low %v4393_v28, %v4409_v16  ;;  %v4450_v31 = vcombine.high %v4393_v28, %v4409_v16  ;;  %v4465_v57 = vcombine.low %v4400_v12, %v4416_v4  ;;  %v4369_v37 = vrot.slane %v4361_v40, %v8414_v14  ;;  %v4525_v28 = vld [vmem:[%s8528_s3 + $0x20] sm:$0xff] }
 0x304   : > { %v4244_v15 = vpop.f32.mrf.mxu1  ;;  %v4337_v16 = vrot.slane %v4329_v63, %v8414_v14  ;;  %v4466_v8 = vcombine.high %v4400_v12, %v4416_v4 }
 0x305   : > { %v4417_v27 = vcombine.low %v4173_v21, %v4244_v15  ;;  %v4457_v13 = vrot.slane %v4449_v39, %v8414_v14  ;;  %v4418_v29 = vcombine.high %v4173_v21, %v4244_v15  ;;  %v4464_v33 = vrot.slane %v4450_v31, %v8414_v14 }
 0x306   : > { %v4246_v26 = vpop.f32.mrf.mxu1  ;;  %v4473_v56 = vrot.slane %v4465_v57, %v8414_v14  ;;  %v4380_v15 = vcombine.high %v4328_v45, %v4360_v48  ;;  %v4381_v43 = vcombine.low %v4337_v16, %v4369_v37 }
 0x307   : > { %v4433_v54 = vcombine.low %v4175_v41, %v4246_v26  ;;  %v4425_v49 = vrot.slane %v4417_v27, %v8395_v47  ;;  %v4434_v5 = vcombine.high %v4175_v41, %v4246_v26  ;;  %v4432_v25 = vrot.slane %v4418_v29, %v8395_v47  ;;  %v4523_v41 = vld [vmem:[%s8528_s3 + $0x10] sm:$0xff] }
 0x308   : > { %v4362_v26 = vcombine.high %v4296_v61, %v4312_v44 }
 0x309   : > { %v4441_v23 = vrot.slane %v4433_v54, %v8395_v47  ;;  %v4448_v6 = vrot.slane %v4434_v5, %v8395_v47  ;;  %v4330_v54 = vcombine.high %v4264_v51, %v4280_v10  ;;  %v4528_v5 = vld [vmem:[%s8528_s3 + $0x38] sm:$0xff] }
 0x30a   : > { %v4376_v39 = vrot.slane %v4362_v26, %v8414_v14 }
 0x30b   : > { %v4481_v20 = vcombine.low %v4425_v49, %v4441_v23  ;;  %v4482_v0 = vcombine.high %v4425_v49, %v4441_v23  ;;  %v4497_v59 = vcombine.low %v4432_v25, %v4448_v6  ;;  %v4498_v60 = vcombine.high %v4432_v25, %v4448_v6 }
 0x30c   : > { %v4480_v49 = vrot.slane %v4466_v8, %v8414_v14  ;;  %v4382_v23 = vcombine.high %v4337_v16, %v4369_v37 }
 0x30d   : > { %v4489_v9 = vrot.slane %v4481_v20, %v8414_v14  ;;  %v4496_v24 = vrot.slane %v4482_v0, %v8414_v14  ;;  %v4505_v47 = vrot.slane %v4497_v59, %v8414_v14  ;;  %v4512_v11 = vrot.slane %v4498_v60, %v8414_v14 }
 0x30e   : > { %v4344_v20 = vrot.slane %v4330_v54, %v8414_v14 }
 0x30f   : > { %v4513_v42 = vcombine.low %v4457_v13, %v4489_v9  ;;  %v4514_v55 = vcombine.high %v4457_v13, %v4489_v9  ;;  %v4515_v21 = vcombine.low %v4464_v33, %v4496_v24  ;;  %v4516_v52 = vcombine.high %v4464_v33, %v4496_v24  ;;  %v4527_v9 = vld [vmem:[%s8528_s3 + $0x30] sm:$0xff] }
 0x310   : > { %v4517_v27 = vcombine.low %v4473_v56, %v4505_v47  ;;  %v4518_v38 = vcombine.high %v4473_v56, %v4505_v47  ;;  %v4519_v53 = vcombine.low %v4480_v49, %v4512_v11  ;;  %v4383_v13 = vcombine.low %v4344_v20, %v4376_v39 }
 0x311   : > { %6319 = vmatpush3.msra.mxu1 %v4513_v42  ;;  %v4520_v14 = vcombine.high %v4480_v49, %v4512_v11  ;;  %v4384_v36 = vcombine.high %v4344_v20, %v4376_v39 }
 0x312   : > { %6320 = vmatprep.subr.mxu1 %v8741_v30 }
 0x313   : > { %6321 = vmatpush3.msra.mxu1 %v4377_v1 }
 0x314   : > { %6325 = vmatprep.subr.mxu1 %v8741_v30  ;;  %6323 = vmatmul.mubr.msk.f32.vlgmr.msra.gmra.mxu1 %vm3677_vm4, %v4521_v62 }
 0x315   : > { %6326 = vmatpush3.msra.mxu1 %v4514_v55  ;;  %6329 = vmatprep.mubr.msk.f32.mxu1 %vm6430_vm5, %v8741_v30 }
 0x316   : > { %6327 = vmatprep.subr.mxu1 %v8741_v30 }
 0x317   : > { %6328 = vmatpush3.msra.mxu1 %v4378_v32 }
 0x318   : > { %6332 = vmatprep.subr.mxu1 %v8741_v30  ;;  %6330 = vmatmul.mubr.msk.f32.vlgmr.msra.gmra.mxu1 %vm3677_vm4, %v4522_v17 }
 0x319   : > { %6333 = vmatpush3.msra.mxu1 %v4515_v21  ;;  %6336 = vmatprep.mubr.msk.f32.mxu1 %vm6430_vm5, %v8741_v30 }
 0x31a   : > { %6334 = vmatprep.subr.mxu1 %v8741_v30 }
 0x31b   : > { %6335 = vmatpush3.msra.mxu1 %v4379_v35 }
 0x31c   : > { %6339 = vmatprep.subr.mxu1 %v8741_v30  ;;  %6337 = vmatmul.mubr.msk.f32.vlgmr.msra.gmra.mxu1 %vm3677_vm4, %v4523_v41 }
 0x31d   : > { %6340 = vmatpush3.msra.mxu1 %v4516_v52  ;;  %6343 = vmatprep.mubr.msk.f32.mxu1 %vm6430_vm5, %v8741_v30 }
 0x31e   : > { %6341 = vmatprep.subr.mxu1 %v8741_v30 }
 0x31f   : > { %6342 = vmatpush3.msra.mxu1 %v4380_v15 }
 0x320   : > { %6346 = vmatprep.subr.mxu1 %v8741_v30  ;;  %6344 = vmatmul.mubr.msk.f32.vlgmr.msra.gmra.mxu1 %vm3677_vm4, %v4524_v19 }
 0x321   : > { %6347 = vmatpush3.msra.mxu1 %v4517_v27  ;;  %6350 = vmatprep.mubr.msk.f32.mxu1 %vm6430_vm5, %v8741_v30 }
 0x322   : > { %6348 = vmatprep.subr.mxu1 %v8741_v30 }
 0x323   : > { %6349 = vmatpush3.msra.mxu1 %v4381_v43 }
 0x324   : > { %6353 = vmatprep.subr.mxu1 %v8741_v30  ;;  %6351 = vmatmul.mubr.msk.f32.vlgmr.msra.gmra.mxu1 %vm3677_vm4, %v4525_v28 }
 0x325   : > { %6354 = vmatpush3.msra.mxu1 %v4518_v38  ;;  %6357 = vmatprep.mubr.msk.f32.mxu1 %vm6430_vm5, %v8741_v30 }
 0x326   : > { %6355 = vmatprep.subr.mxu1 %v8741_v30 }
 0x327   : > { %6356 = vmatpush3.msra.mxu1 %v4382_v23 }
 0x328   : > { %6360 = vmatprep.subr.mxu1 %v8741_v30  ;;  %6358 = vmatmul.mubr.msk.f32.vlgmr.msra.gmra.mxu1 %vm3677_vm4, %v4526_v2 }
 0x329   : > { %6361 = vmatpush3.msra.mxu1 %v4519_v53  ;;  %6364 = vmatprep.mubr.msk.f32.mxu1 %vm6430_vm5, %v8741_v30 }
 0x32a   : > { %6362 = vmatprep.subr.mxu1 %v8741_v30 }
 0x32b   : > { %6363 = vmatpush3.msra.mxu1 %v4383_v13 }
 0x32c   : > { %6367 = vmatprep.subr.mxu1 %v8741_v30  ;;  %6365 = vmatmul.mubr.msk.f32.vlgmr.msra.gmra.mxu1 %vm3677_vm4, %v4527_v9 }
 0x32d   : > { %6368 = vmatpush3.msra.mxu1 %v4520_v14  ;;  %6371 = vmatprep.mubr.msk.f32.mxu1 %vm6430_vm5, %v8741_v30 }
 0x32e   : > { %6369 = vmatprep.subr.mxu1 %v8741_v30 }
 0x32f   : > { %6370 = vmatpush3.msra.mxu1 %v4384_v36 }
 0x330   : > { %6372 = vmatmul.mubr.msk.f32.vlgmr.msra.gmra.mxu1 %vm3677_vm4, %v4528_v5 }
 0x3d4   : > { %v4598_v0 = vpop.f32.mrf.mxu1 }
 0x3d5   : > { %5113 = vst [vmem:[%s234_s14] sm:$0xff] %v4598_v0 }
 0x3d6   : > { %v6324_v42 = vpop.f32.mrf.mxu1 }
 0x3d8   : > { %v4671_v18 = vpop.f32.mrf.mxu1 }
 0x3d9   : > { %5114 = vst [vmem:[%s234_s14 + $0x8] sm:$0xff] %v4671_v18 }
 0x3da   : > { %v6331_v7 = vpop.f32.mrf.mxu1 }
 0x3dc   : > { %v4744_v46 = vpop.f32.mrf.mxu1 }
 0x3dd   : > { %5115 = vst [vmem:[%s234_s14 + $0x10] sm:$0xff] %v4744_v46 }
 0x3de   : > { %v6338_v31 = vpop.f32.mrf.mxu1 }
 0x3e0   : > { %v4817_v29 = vpop.f32.mrf.mxu1 }
 0x3e1   : > { %5116 = vst [vmem:[%s234_s14 + $0x18] sm:$0xff] %v4817_v29 }
 0x3e2   : > { %v6345_v30 = vpop.f32.mrf.mxu1 }
 0x3e4   : > { %v4890_v1 = vpop.f32.mrf.mxu1 }
 0x3e5   : > { %5117 = vst [vmem:[%s234_s14 + $0x20] sm:$0xff] %v4890_v1 }
 0x3e6   : > { %v6352_v62 = vpop.f32.mrf.mxu1 }
 0x3e8   : > { %v4963_v34 = vpop.f32.mrf.mxu1 }
 0x3e9   : > { %5118 = vst [vmem:[%s234_s14 + $0x28] sm:$0xff] %v4963_v34 }
 0x3ea   : > { %v6359_v22 = vpop.f32.mrf.mxu1 }
 0x3ec   : > { %v5036_v58 = vpop.f32.mrf.mxu1 }
 0x3ed   : > { %5119 = vst [vmem:[%s234_s14 + $0x30] sm:$0xff] %v5036_v58 }
 0x3ee   : > { %v6366_v50 = vpop.f32.mrf.mxu1 }
 0x3f0   : > { %v5109_v3 = vpop.f32.mrf.mxu1 }
 0x3f1   : > { %5120 = vst [vmem:[%s234_s14 + $0x38] sm:$0xff] %v5109_v3 }
 0x3f2   : > { %v6373_v6 = vpop.f32.mrf.mxu1 }
 0x3f3 PF: > { %s14_s17 = sadd.s32 1, %s6426_s17   ;;  %s8749_s15 = smov %s6422_s16 }
 0x3f4   : > { %p11_p5 = scmp.ge.s32.totalorder %s14_s17, 4   ;;  %s8750_s16 = smov %s8752_s18 }
 0x3f6   :  { %13 = sbr.rel (!%p11_p5) target bundleno = 2 (0x2), region = 77 }

</bundles_post_ra>
